<compile_context>
chip_gen: v7x
topology: tpu7x:2x2x1
jax: 0.10.0
libtpu: 0.0.40
codegen_flags: <defaults>
</compile_context>

<pallas_src>
import functools

import jax
import jax.numpy as jnp
from jax.experimental import pallas as pl
from jax.experimental.pallas import tpu as pltpu

INPUT_SIZE = 400
HIDDEN_SIZE = 512
FEAT_SIZE = 256
HEAD_SIZES = {"discard": 34, "call": 4, "riichi": 2, "win": 2}
HEADS_TOTAL = sum(HEAD_SIZES.values())   # 42
HEADS_PAD = 128                          # 42 -> 128: lane-dense output slab
TILE_B_MAX = 1024                        # M tile for large batches


def _round_up(n, m):
    return ((n + m - 1) // m) * m


def _choose_tile_b(B):
    """Pick the batch tile.  B <= 16 -> one full-batch block (block dim ==
    array dim is always legal).  Otherwise guarantee >= 2 grid steps so the
    'parallel' batch axis can shard across v7x's two TensorCores, capped at
    TILE_B_MAX to stay comfortably inside scoped VMEM on every generation."""
    if B <= 16:
        return B
    half = -(-B // 2)                    # ceil(B / 2)
    return min(_round_up(half, 8), TILE_B_MAX)


def mahjong_kernel(x_ref, w1_ref, b1_ref, w2_ref, b2_ref, w3_ref, b3_ref,
                   wh_ref, bh_ref, out_ref):
    # feature_net: Linear -> ReLU -> (Dropout=id) -> Linear -> ReLU ->
    #              (Dropout=id) -> Linear -> ReLU ; then fused 4-head Linear.
    # bf16 MXU operands, f32 accumulation; bias + ReLU in f32.
    x = x_ref[...].astype(jnp.bfloat16)              # cast in-kernel (no pre-pass)

    h1 = jnp.dot(x, w1_ref[...], preferred_element_type=jnp.float32)
    h1 = jnp.maximum(h1 + b1_ref[...], 0.0)

    h2 = jnp.dot(h1.astype(jnp.bfloat16), w2_ref[...],
                 preferred_element_type=jnp.float32)
    h2 = jnp.maximum(h2 + b2_ref[...], 0.0)

    feats = jnp.dot(h2.astype(jnp.bfloat16), w3_ref[...],
                    preferred_element_type=jnp.float32)
    feats = jnp.maximum(feats + b3_ref[...], 0.0)

    # Fused heads: one [256, 128] matmul covering discard/call/riichi/win (+pad).
    logits = jnp.dot(feats.astype(jnp.bfloat16), wh_ref[...],
                     preferred_element_type=jnp.float32)
    out_ref[...] = logits + bh_ref[...]


def init_params(key):
    """Deterministic synthetic parameters, already packed into kernel layout:
    weights [in, out] bf16 (head weights zero-padded to 128 cols), biases
    [1, out] f32.  A real deployment must repack the torch state_dict the
    same way (transpose, concat heads, zero-pad, bf16-cast)."""
    ks = jax.random.split(key, 7)

    def lin(kw, kb, fan_in, fan_out):
        w = jax.random.normal(kw, (fan_in, fan_out), jnp.float32) * (1.0 / jnp.sqrt(fan_in))
        b = jax.random.normal(kb, (1, fan_out), jnp.float32) * 0.01
        return w, b

    w1, b1 = lin(ks[0], ks[1], INPUT_SIZE, HIDDEN_SIZE)
    w2, b2 = lin(ks[2], ks[3], HIDDEN_SIZE, HIDDEN_SIZE)
    w3, b3 = lin(ks[4], ks[5], HIDDEN_SIZE, FEAT_SIZE)

    # Per-head linears, concatenated along the output axis -> [256, 42].
    head_ws, head_bs = [], []
    hkeys = jax.random.split(ks[6], 2 * len(HEAD_SIZES))
    for i, (_, out_dim) in enumerate(HEAD_SIZES.items()):
        hw, hb = lin(hkeys[2 * i], hkeys[2 * i + 1], FEAT_SIZE, out_dim)
        head_ws.append(hw)
        head_bs.append(hb)
    wh = jnp.concatenate(head_ws, axis=1)   # [256, 42]
    bh = jnp.concatenate(head_bs, axis=1)   # [1, 42]

    # Pad fused head output to a lane-dense 128-wide slab (zeros are inert).
    whp = jnp.zeros((FEAT_SIZE, HEADS_PAD), jnp.float32).at[:, :HEADS_TOTAL].set(wh)
    bhp = jnp.zeros((1, HEADS_PAD), jnp.float32).at[:, :HEADS_TOTAL].set(bh)

    # Weights bf16 (MXU operands), biases f32 (added to f32 accumulators).
    return (w1.astype(jnp.bfloat16), b1,
            w2.astype(jnp.bfloat16), b2,
            w3.astype(jnp.bfloat16), b3,
            whp.astype(jnp.bfloat16), bhp)


@functools.partial(jax.jit, static_argnames=("tile_b",))
def _forward(x, params, *, tile_b):
    (w1, b1, w2, b2, w3, b3, wh, bh) = params
    B = x.shape[0]
    grid = (pl.cdiv(B, tile_b),)

    # Weights/biases stay VMEM-resident across grid steps (index_map -> (0,0)).
    # NOTE: default double-buffering of these constant operands costs ~1.4 MiB
    # of extra VMEM; left as-is since the footprint is far under the limit.
    def fixed(shape):
        return pl.BlockSpec(shape, lambda i: (0, 0))

    flops = 2 * B * (INPUT_SIZE * HIDDEN_SIZE + HIDDEN_SIZE * HIDDEN_SIZE
                     + HIDDEN_SIZE * FEAT_SIZE + FEAT_SIZE * HEADS_PAD)
    weight_bytes = 2 * (INPUT_SIZE * HIDDEN_SIZE + HIDDEN_SIZE * HIDDEN_SIZE
                        + HIDDEN_SIZE * FEAT_SIZE + FEAT_SIZE * HEADS_PAD)
    bias_bytes = 4 * (HIDDEN_SIZE + HIDDEN_SIZE + FEAT_SIZE + HEADS_PAD)
    io_bytes = B * INPUT_SIZE * x.dtype.itemsize + B * HEADS_PAD * 4

    out = pl.pallas_call(
        mahjong_kernel,
        out_shape=jax.ShapeDtypeStruct((B, HEADS_PAD), jnp.float32),
        grid=grid,
        in_specs=[
            pl.BlockSpec((tile_b, INPUT_SIZE), lambda i: (i, 0)),  # x tile (f32, full K)
            fixed((INPUT_SIZE, HIDDEN_SIZE)),                      # w1
            fixed((1, HIDDEN_SIZE)),                               # b1
            fixed((HIDDEN_SIZE, HIDDEN_SIZE)),                     # w2
            fixed((1, HIDDEN_SIZE)),                               # b2
            fixed((HIDDEN_SIZE, FEAT_SIZE)),                       # w3
            fixed((1, FEAT_SIZE)),                                 # b3
            fixed((FEAT_SIZE, HEADS_PAD)),                         # wh (fused heads)
            fixed((1, HEADS_PAD)),                                 # bh
        ],
        out_specs=pl.BlockSpec((tile_b, HEADS_PAD), lambda i: (i, 0)),
        compiler_params=pltpu.CompilerParams(
            dimension_semantics=("parallel",),     # megacore sharding on v7x
            vmem_limit_bytes=32 * 1024 * 1024,     # enough for tile_b=1024 on all gens
        ),
        cost_estimate=pl.CostEstimate(
            flops=flops, transcendentals=0,
            bytes_accessed=weight_bytes + bias_bytes + io_bytes),
    )(x, w1, b1, w2, b2, w3, b3, wh, bh)
    return out


def mahjong_forward(x, params):
    """x: [B, 400] float32 (or bf16). Returns dict of per-head logits (f32)."""
    B = x.shape[0]
    tile_b = _choose_tile_b(B)

    out = _forward(x, params, tile_b=tile_b)

    # Narrow the lane-dense slab once, then split into the torch-style dict.
    out = out[:B, :HEADS_TOTAL]
    result = {}
    off = 0
    for name, size in HEAD_SIZES.items():
        result[name] = out[:, off:off + size]
        off += size
    return result


if __name__ == "__main__":
    key = jax.random.PRNGKey(0)
    pkey, xkey = jax.random.split(key)

    params = init_params(pkey)
    B = 2
    x = jax.random.normal(xkey, (B, INPUT_SIZE), jnp.float32)

    out = mahjong_forward(x, params)
    jax.block_until_ready(out)

    assert out["discard"].shape == (B, 34)
    assert out["call"].shape == (B, 4)
    assert out["riichi"].shape == (B, 2)
    assert out["win"].shape == (B, 2)
    assert all(bool(jnp.all(jnp.isfinite(v))) for v in out.values())
    print("KERNEL_OK")
</pallas_src>

<mosaic_0001>
module attributes {stable_mosaic.version = 11 : i64} {
  func.func @mahjong_kernel(%arg0: i32, %arg1: memref<2x400xf32, #tpu.memory_space<vmem>>, %arg2: memref<400x512xbf16, #tpu.memory_space<vmem>>, %arg3: memref<1x512xf32, #tpu.memory_space<vmem>>, %arg4: memref<512x512xbf16, #tpu.memory_space<vmem>>, %arg5: memref<1x512xf32, #tpu.memory_space<vmem>>, %arg6: memref<512x256xbf16, #tpu.memory_space<vmem>>, %arg7: memref<1x256xf32, #tpu.memory_space<vmem>>, %arg8: memref<256x128xbf16, #tpu.memory_space<vmem>>, %arg9: memref<1x128xf32, #tpu.memory_space<vmem>>, %arg10: memref<2x128xf32, #tpu.memory_space<vmem>>) attributes {dimension_semantics = [#tpu.dimension_semantics<parallel>], iteration_bounds = array<i64: 1>, scalar_prefetch = 0 : i64, scratch_operands = 0 : i64, tpu.core_type = #tpu.core_type<tc>, window_params = [{transform_indices = @transform_0, window_bounds = array<i64: 2, 400>}, {pipeline_mode = #tpu.pipeline_mode<synchronous>, transform_indices = @transform_1, window_bounds = array<i64: 400, 512>}, {pipeline_mode = #tpu.pipeline_mode<synchronous>, transform_indices = @transform_2, window_bounds = array<i64: 1, 512>}, {pipeline_mode = #tpu.pipeline_mode<synchronous>, transform_indices = @transform_3, window_bounds = array<i64: 512, 512>}, {pipeline_mode = #tpu.pipeline_mode<synchronous>, transform_indices = @transform_4, window_bounds = array<i64: 1, 512>}, {pipeline_mode = #tpu.pipeline_mode<synchronous>, transform_indices = @transform_5, window_bounds = array<i64: 512, 256>}, {pipeline_mode = #tpu.pipeline_mode<synchronous>, transform_indices = @transform_6, window_bounds = array<i64: 1, 256>}, {pipeline_mode = #tpu.pipeline_mode<synchronous>, transform_indices = @transform_7, window_bounds = array<i64: 256, 128>}, {pipeline_mode = #tpu.pipeline_mode<synchronous>, transform_indices = @transform_8, window_bounds = array<i64: 1, 128>}, {transform_indices = @transform_9, window_bounds = array<i64: 2, 128>}]} {
    %c0 = arith.constant 0 : index
    %c0_0 = arith.constant 0 : index
    %0 = vector.load %arg1[%c0, %c0_0] : memref<2x400xf32, #tpu.memory_space<vmem>>, vector<2x400xf32>
    %1 = arith.truncf %0 : vector<2x400xf32> to vector<2x400xbf16>
    %c0_1 = arith.constant 0 : index
    %c0_2 = arith.constant 0 : index
    %2 = vector.load %arg2[%c0_1, %c0_2] : memref<400x512xbf16, #tpu.memory_space<vmem>>, vector<400x512xbf16>
    %cst = arith.constant dense<0.000000e+00> : vector<2x512xf32>
    %3 = tpu.matmul %1, %2, %cst {dimension_numbers = #tpu.dot_dimension_numbers<[1], [0], [0], [1], [0, 0, 1, 1], [], []>} : vector<2x400xbf16>, vector<400x512xbf16>, vector<2x512xf32> -> vector<2x512xf32>
    %c0_3 = arith.constant 0 : index
    %c0_4 = arith.constant 0 : index
    %4 = vector.load %arg3[%c0_3, %c0_4] : memref<1x512xf32, #tpu.memory_space<vmem>>, vector<1x512xf32>
    %5 = vector.broadcast %4 : vector<1x512xf32> to vector<2x512xf32>
    %6 = arith.addf %3, %5 : vector<2x512xf32>
    %cst_5 = arith.constant 0.000000e+00 : f32
    %7 = vector.broadcast %cst_5 : f32 to vector<2x512xf32>
    %8 = arith.maximumf %6, %7 : vector<2x512xf32>
    %9 = arith.truncf %8 : vector<2x512xf32> to vector<2x512xbf16>
    %c0_6 = arith.constant 0 : index
    %c0_7 = arith.constant 0 : index
    %10 = vector.load %arg4[%c0_6, %c0_7] : memref<512x512xbf16, #tpu.memory_space<vmem>>, vector<512x512xbf16>
    %cst_8 = arith.constant dense<0.000000e+00> : vector<2x512xf32>
    %11 = tpu.matmul %9, %10, %cst_8 {dimension_numbers = #tpu.dot_dimension_numbers<[1], [0], [0], [1], [0, 0, 1, 1], [], []>} : vector<2x512xbf16>, vector<512x512xbf16>, vector<2x512xf32> -> vector<2x512xf32>
    %c0_9 = arith.constant 0 : index
    %c0_10 = arith.constant 0 : index
    %12 = vector.load %arg5[%c0_9, %c0_10] : memref<1x512xf32, #tpu.memory_space<vmem>>, vector<1x512xf32>
    %13 = vector.broadcast %12 : vector<1x512xf32> to vector<2x512xf32>
    %14 = arith.addf %11, %13 : vector<2x512xf32>
    %cst_11 = arith.constant 0.000000e+00 : f32
    %15 = vector.broadcast %cst_11 : f32 to vector<2x512xf32>
    %16 = arith.maximumf %14, %15 : vector<2x512xf32>
    %17 = arith.truncf %16 : vector<2x512xf32> to vector<2x512xbf16>
    %c0_12 = arith.constant 0 : index
    %c0_13 = arith.constant 0 : index
    %18 = vector.load %arg6[%c0_12, %c0_13] : memref<512x256xbf16, #tpu.memory_space<vmem>>, vector<512x256xbf16>
    %cst_14 = arith.constant dense<0.000000e+00> : vector<2x256xf32>
    %19 = tpu.matmul %17, %18, %cst_14 {dimension_numbers = #tpu.dot_dimension_numbers<[1], [0], [0], [1], [0, 0, 1, 1], [], []>} : vector<2x512xbf16>, vector<512x256xbf16>, vector<2x256xf32> -> vector<2x256xf32>
    %c0_15 = arith.constant 0 : index
    %c0_16 = arith.constant 0 : index
    %20 = vector.load %arg7[%c0_15, %c0_16] : memref<1x256xf32, #tpu.memory_space<vmem>>, vector<1x256xf32>
    %21 = vector.broadcast %20 : vector<1x256xf32> to vector<2x256xf32>
    %22 = arith.addf %19, %21 : vector<2x256xf32>
    %cst_17 = arith.constant 0.000000e+00 : f32
    %23 = vector.broadcast %cst_17 : f32 to vector<2x256xf32>
    %24 = arith.maximumf %22, %23 : vector<2x256xf32>
    %25 = arith.truncf %24 : vector<2x256xf32> to vector<2x256xbf16>
    %c0_18 = arith.constant 0 : index
    %c0_19 = arith.constant 0 : index
    %26 = vector.load %arg8[%c0_18, %c0_19] : memref<256x128xbf16, #tpu.memory_space<vmem>>, vector<256x128xbf16>
    %cst_20 = arith.constant dense<0.000000e+00> : vector<2x128xf32>
    %27 = tpu.matmul %25, %26, %cst_20 {dimension_numbers = #tpu.dot_dimension_numbers<[1], [0], [0], [1], [0, 0, 1, 1], [], []>} : vector<2x256xbf16>, vector<256x128xbf16>, vector<2x128xf32> -> vector<2x128xf32>
    %c0_21 = arith.constant 0 : index
    %c0_22 = arith.constant 0 : index
    %28 = vector.load %arg9[%c0_21, %c0_22] : memref<1x128xf32, #tpu.memory_space<vmem>>, vector<1x128xf32>
    %29 = vector.broadcast %28 : vector<1x128xf32> to vector<2x128xf32>
    %30 = arith.addf %27, %29 : vector<2x128xf32>
    %c0_23 = arith.constant 0 : index
    %c0_24 = arith.constant 0 : index
    %31 = vector.load %arg10[%c0_23, %c0_24] : memref<2x128xf32, #tpu.memory_space<vmem>>, vector<2x128xf32>
    tpu.vector_store %arg10[%c0_23, %c0_24], %30 {strides = array<i32>} : memref<2x128xf32, #tpu.memory_space<vmem>>, vector<2x128xf32>,
    return
  }
  func.func @transform_0(%arg0: i32) -> (i32, i32) {
    %c0_i32 = arith.constant 0 : i32
    %c0_i32_0 = arith.constant 0 : i32
    return %arg0, %c0_i32 : i32, i32
  }
  func.func @transform_1(%arg0: i32) -> (i32, i32) {
    %c0_i32 = arith.constant 0 : i32
    %c0_i32_0 = arith.constant 0 : i32
    %c0_i32_1 = arith.constant 0 : i32
    return %c0_i32, %c0_i32_0 : i32, i32
  }
  func.func @transform_2(%arg0: i32) -> (i32, i32) {
    %c0_i32 = arith.constant 0 : i32
    %c0_i32_0 = arith.constant 0 : i32
    %c0_i32_1 = arith.constant 0 : i32
    return %c0_i32, %c0_i32_0 : i32, i32
  }
  func.func @transform_3(%arg0: i32) -> (i32, i32) {
    %c0_i32 = arith.constant 0 : i32
    %c0_i32_0 = arith.constant 0 : i32
    %c0_i32_1 = arith.constant 0 : i32
    return %c0_i32, %c0_i32_0 : i32, i32
  }
  func.func @transform_4(%arg0: i32) -> (i32, i32) {
    %c0_i32 = arith.constant 0 : i32
    %c0_i32_0 = arith.constant 0 : i32
    %c0_i32_1 = arith.constant 0 : i32
    return %c0_i32, %c0_i32_0 : i32, i32
  }
  func.func @transform_5(%arg0: i32) -> (i32, i32) {
    %c0_i32 = arith.constant 0 : i32
    %c0_i32_0 = arith.constant 0 : i32
    %c0_i32_1 = arith.constant 0 : i32
    return %c0_i32, %c0_i32_0 : i32, i32
  }
  func.func @transform_6(%arg0: i32) -> (i32, i32) {
    %c0_i32 = arith.constant 0 : i32
    %c0_i32_0 = arith.constant 0 : i32
    %c0_i32_1 = arith.constant 0 : i32
    return %c0_i32, %c0_i32_0 : i32, i32
  }
  func.func @transform_7(%arg0: i32) -> (i32, i32) {
    %c0_i32 = arith.constant 0 : i32
    %c0_i32_0 = arith.constant 0 : i32
    %c0_i32_1 = arith.constant 0 : i32
    return %c0_i32, %c0_i32_0 : i32, i32
  }
  func.func @transform_8(%arg0: i32) -> (i32, i32) {
    %c0_i32 = arith.constant 0 : i32
    %c0_i32_0 = arith.constant 0 : i32
    %c0_i32_1 = arith.constant 0 : i32
    return %c0_i32, %c0_i32_0 : i32, i32
  }
  func.func @transform_9(%arg0: i32) -> (i32, i32) {
    %c0_i32 = arith.constant 0 : i32
    %c0_i32_0 = arith.constant 0 : i32
    return %arg0, %c0_i32 : i32, i32
  }
}

</mosaic_0001>

<bundles_post_ra>
// kernel: _forward.1
= control target key start
LH: loop header
LB: loop body
LE: loop exit
PB: predicated region body
PF: predicated region fallthrough
CT: control target
= control target key end

     0   :  { %14 = vsyncpa [#allocation3], 0  ;;  %s3751_s0 = inlined_call_operand.hbm [shape: f32[2,400], index: 0, kind: input, shape index: {}]   ;;  %s3752_s1 = inlined_call_operand.hbm [shape: bf16[400,512], index: 1, kind: input, shape index: {}]   ;;  %s3753_s2 = inlined_call_operand.vmem [shape: f32[1,512], index: 2, kind: input, shape index: {}]   ;;  %s3754_s3 = inlined_call_operand.hbm [shape: bf16[512,512], index: 3, kind: input, shape index: {}]   ;;  %s3755_s4 = inlined_call_operand.vmem [shape: f32[1,512], index: 4, kind: input, shape index: {}]   ;;  %s3756_s5 = inlined_call_operand.hbm [shape: bf16[512,256], index: 5, kind: input, shape index: {}]   ;;  %s3757_s6 = inlined_call_operand.vmem [shape: f32[1,256], index: 6, kind: input, shape index: {}]   ;;  %s3758_s7 = inlined_call_operand.hbm [shape: bf16[256,128], index: 7, kind: input, shape index: {}]   ;;  %s3759_s8 = inlined_call_operand.vmem [shape: f32[1,128], index: 8, kind: input, shape index: {}]   ;;  %s3760_s9 = inlined_call_operand.hbm [shape: f32[2,128], index: 9, kind: output, shape index: {}]  }
   0x1   :  { %15 = vsyncpa [#allocation6], 0 }
   0x2   :  { %16 = vsyncpa [#allocation9], 0 }
   0x3   :  { %17 = vsyncpa [#allocation4], 0  ;;  %s3531_s30 = smov [#allocation5]   ;;  %s3391_s13 = scalar_lea.hbm %s3752_s1, 12800 }
   0x4   :  { %s33_s10 = sshll.u32 %s3531_s30, 4  ;;  %p3392_p0 = scmp.ne.s32.totalorder %s3752_s1, %s3391_s13  ;;  %s34_s10 = int_to_ptr.vmem [resolvable:$true] %s33_s10 }
   0x5   :  { %p3395_p1 = scmp.lt.u32.totalorder %s3391_s13, %s3752_s1 }
   0x7   :  { %p3397_p2 = pnand %p3395_p1, %p3392_p0 }
   0x9   :  { %3400 = shalt.err (!%p3397_p2)
}
   0xa   :  { %s3401_s18 = scalar_lea.vmem %s34_s10, 12800  ;;  %p3406_p4 = scmp.lt.s32.totalorder %s34_s10, %s34_s10 }
   0xb   :  { %p3402_p3 = scmp.ne.s32.totalorder %s34_s10, %s3401_s18  ;;  %p3407_p5 = scmp.lt.s32.totalorder %s3401_s18, %s3401_s18 }
   0xd   :  { %p3408_p6 = por %p3407_p5, %p3406_p4 }
   0xf   :  { %p3409_p7 = pnand %p3408_p6, %p3402_p3 }
  0x11   :  { %3412 = shalt.err (!%p3409_p7)
}
  0x12   :  { %s3532_s19 = smov 256   ;;  %s3533_s20 = smov 16  }
  0x13   :  { %39 = dma.hbm_to_vmem [thread:$0]  %s3752_s1, 12800, %s34_s10, [#allocation6], %s3532_s19, %s3532_s19, %s3533_s20  }
  0x14   :  { %s3534_s23 = smov [#allocation8]   ;;  %s3413_s27 = scalar_lea.hbm %s3756_s5, 8192 }
  0x15   :  { %s61_s24 = sshll.u32 %s3534_s23, 4  ;;  %p3414_p8 = scmp.ne.s32.totalorder %s3756_s5, %s3413_s27  ;;  %s62_s24 = int_to_ptr.vmem [resolvable:$true] %s61_s24 }
  0x16   :  { %p3417_p9 = scmp.lt.u32.totalorder %s3413_s27, %s3756_s5 }
  0x18   :  { %p3419_p10 = pnand %p3417_p9, %p3414_p8 }
  0x1a   :  { %3422 = shalt.err (!%p3419_p10)
}
  0x1b   :  { %s3423_s12 = scalar_lea.vmem %s62_s24, 8192  ;;  %p3428_p12 = scmp.lt.s32.totalorder %s62_s24, %s62_s24 }
  0x1c   :  { %p3424_p11 = scmp.ne.s32.totalorder %s62_s24, %s3423_s12  ;;  %p3429_p13 = scmp.lt.s32.totalorder %s3423_s12, %s3423_s12 }
  0x1e   :  { %p3430_p0 = por %p3429_p13, %p3428_p12 }
  0x20   :  { %p3431_p1 = pnand %p3430_p0, %p3424_p11 }
  0x22   :  { %3434 = shalt.err (!%p3431_p1)
}
  0x23   :  { %s3535_s1 = smov 128   ;;  %s3536_s10 = smov 8  }
  0x24   :  { %67 = dma.hbm_to_vmem [thread:$0]  %s3756_s5, 8192, %s62_s24, [#allocation9], %s3535_s1, %s3535_s1, %s3536_s10  }
  0x25   :  { %s3537_s15 = smov [#allocation2]   ;;  %s3538_s17 = smov [#allocation7]  }
  0x26   :  { %s24_s16 = sshll.u32 %s3537_s15, 4  ;;  %s47_s18 = sshll.u32 %s3538_s17, 4  ;;  %s25_s16 = int_to_ptr.vmem [resolvable:$true] %s24_s16  ;;  %s3621_s18 = int_to_ptr.vmem [resolvable:$true] %s47_s18 }
  0x27   :  { %s3435_s23 = scalar_lea.hbm %s3751_s0, 128 }
  0x28   :  { %p3436_p2 = scmp.ne.s32.totalorder %s3751_s0, %s3435_s23  ;;  %p3439_p3 = scmp.lt.u32.totalorder %s3435_s23, %s3751_s0 }
  0x2a   :  { %p3441_p4 = pnand %p3439_p3, %p3436_p2 }
  0x2c   :  { %3444 = shalt.err (!%p3441_p4)
}
  0x2d   :  { %s3445_s5 = scalar_lea.vmem %s25_s16, 128  ;;  %p3450_p6 = scmp.lt.s32.totalorder %s25_s16, %s25_s16 }
  0x2e   :  { %p3446_p5 = scmp.ne.s32.totalorder %s25_s16, %s3445_s5  ;;  %p3451_p7 = scmp.lt.s32.totalorder %s3445_s5, %s3445_s5 }
  0x30   :  { %p3452_p8 = por %p3451_p7, %p3450_p6 }
  0x32   :  { %p3453_p9 = pnand %p3452_p8, %p3446_p5 }
  0x34   :  { %3456 = shalt.err (!%p3453_p9)
}
  0x35   :  { %27 = dma.hbm_to_vmem [thread:$0]  %s3751_s0, 128, %s25_s16, [#allocation3]  }
  0x36   :  { %s3457_s12 = scalar_lea.hbm %s3754_s3, 16384 }
  0x37   :  { %p3458_p10 = scmp.ne.s32.totalorder %s3754_s3, %s3457_s12  ;;  %p3461_p11 = scmp.lt.u32.totalorder %s3457_s12, %s3754_s3 }
  0x39   :  { %p3463_p12 = pnand %p3461_p11, %p3458_p10 }
  0x3b   :  { %3466 = shalt.err (!%p3463_p12)
}
  0x3c   :  { %s3467_s15 = scalar_lea.vmem %s3621_s18, 16384  ;;  %p3472_p0 = scmp.lt.s32.totalorder %s3621_s18, %s3621_s18 }
  0x3d   :  { %p3468_p13 = scmp.ne.s32.totalorder %s3621_s18, %s3467_s15  ;;  %p3473_p1 = scmp.lt.s32.totalorder %s3467_s15, %s3467_s15 }
  0x3f   :  { %p3474_p2 = por %p3473_p1, %p3472_p0 }
  0x41   :  { %p3475_p3 = pnand %p3474_p2, %p3468_p13 }
  0x43   :  { %3478 = shalt.err (!%p3475_p3)
}
  0x44   :  { %53 = dma.hbm_to_vmem [thread:$0]  %s3754_s3, 16384, %s3621_s18, [#allocation6], %s3532_s19, %s3532_s19, %s3533_s20  }
  0x45   :  { %s3539_s17 = smov [#allocation10]   ;;  %s3479_s25 = scalar_lea.hbm %s3758_s7, 2048 }
  0x46   :  { %s75_s21 = sshll.u32 %s3539_s17, 4  ;;  %p3480_p4 = scmp.ne.s32.totalorder %s3758_s7, %s3479_s25  ;;  %s76_s21 = int_to_ptr.vmem [resolvable:$true] %s75_s21 }
  0x47   :  { %p3483_p5 = scmp.lt.u32.totalorder %s3479_s25, %s3758_s7 }
  0x49   :  { %p3485_p6 = pnand %p3483_p5, %p3480_p4 }
  0x4b   :  { %3488 = shalt.err (!%p3485_p6)
}
  0x4c   :  { %s3489_s24 = scalar_lea.vmem %s76_s21, 2048  ;;  %p3494_p8 = scmp.lt.s32.totalorder %s76_s21, %s76_s21 }
  0x4d   :  { %p3490_p7 = scmp.ne.s32.totalorder %s76_s21, %s3489_s24  ;;  %p3495_p9 = scmp.lt.s32.totalorder %s3489_s24, %s3489_s24 }
  0x4f   :  { %p3496_p10 = por %p3495_p9, %p3494_p8 }
  0x51   :  { %p3497_p11 = pnand %p3496_p10, %p3490_p7 }
  0x53   :  { %3500 = shalt.err (!%p3497_p11)
}
  0x54   :  { %s3540_s3 = smov 64   ;;  %s3541_s19 = smov 4  }
  0x55   :  { %81 = dma.hbm_to_vmem [thread:$0]  %s3758_s7, 2048, %s76_s21, [#allocation9], %s3540_s3, %s3540_s3, %s3541_s19  }
  0x56   :  { %3523 = dma.done.wait [#allocation3], 128  }
  0x57   :  { %3524 = vsyncadd [#allocation3], 4294967168 }
  0x58   :  { %3525 = dma.done.wait [#allocation6], 29184  }
  0x59   :  { %3526 = vsyncadd [#allocation6], 4294938112 }
  0x5a   :  { %3527 = dma.done.wait [#allocation9], 10240  }
  0x5b   :  { %3528 = vsyncadd [#allocation9], 4294957056  ;;  %v2936_v0 = vld [vmem:[#allocation5 + $0x4] ss:$16 sps:$4 sm:$0xff]   ;;  %v2940_v2 = vld [vmem:[#allocation5] ss:$16 sps:$4 sm:$0xff]   ;;  %v106_v22 = vlaneseq }
  0x5c   :  { %v2938_v1 = vld [vmem:[#allocation5 + $0x204] ss:$16 sps:$4 sm:$0xff]   ;;  %753 = vmatprep.subr.bf16.mxu0 %v2936_v0  ;;  %v2941_v3 = vld [vmem:[#allocation5 + $0x200] ss:$16 sps:$4 sm:$0xff]   ;;  %v3542_v20 = vmov 1983009808  }
  0x5d   :  { %794 = vmatprep.subr.bf16.mxu1 %v2938_v1  ;;  %v2942_v4 = vld [vmem:[#allocation5 + $0x24] ss:$16 sps:$4 sm:$0xff]   ;;  %754 = vmatpush1.bf16.msra.mxu0 %v2940_v2  ;;  %v2946_v6 = vld [vmem:[#allocation5 + $0x20] ss:$16 sps:$4 sm:$0xff]   ;;  %v104_v21 = vunpack.c.l.s4 %v3542_v20  ;;  %v3667_v27 = vshrl.u32 %v106_v22, 7  ;;  %v100_v35 = vld [vmem:[#allocation2] sm:$0xff] }
  0x5e   :  { %795 = vmatpush1.bf16.msra.mxu1 %v2941_v3  ;;  %v2944_v5 = vld [vmem:[#allocation5 + $0x224] ss:$16 sps:$4 sm:$0xff]   ;;  %755 = vmatprep.subr.bf16.mxu0 %v2942_v4  ;;  %v2947_v7 = vld [vmem:[#allocation5 + $0x220] ss:$16 sps:$4 sm:$0xff]   ;;  %v102_v37 = vcombine.high %v100_v35, %v100_v35  ;;  %vm749_vm0 = vcmask 130048  }
  0x5f   :  { %796 = vmatprep.subr.bf16.mxu1 %v2944_v5  ;;  %v2948_v8 = vld [vmem:[#allocation5 + $0x44] ss:$16 sps:$4 sm:$0xff]   ;;  %v2952_v10 = vld [vmem:[#allocation5 + $0x40] ss:$16 sps:$4 sm:$0xff]   ;;  %v105_v26 = vunpack.c.0.s8 %v104_v21  ;;  %v2995_v51 = vld [vmem:[#allocation5 + $0xc] ss:$16 sps:$4 sm:$0xff]  }
  0x60   :  { %v2950_v9 = vld [vmem:[#allocation5 + $0x244] ss:$16 sps:$4 sm:$0xff]   ;;  %v2953_v11 = vld [vmem:[#allocation5 + $0x240] ss:$16 sps:$4 sm:$0xff]   ;;  %v2993_v53 = vld [vmem:[#allocation5 + $0x8] ss:$16 sps:$4 sm:$0xff]  }
  0x61   :  { %756 = vmatpush1.bf16.msra.mxu0 %v2946_v6  ;;  %v2954_v12 = vld [vmem:[#allocation5 + $0x64] ss:$16 sps:$4 sm:$0xff]   ;;  %v2958_v14 = vld [vmem:[#allocation5 + $0x60] ss:$16 sps:$4 sm:$0xff]   ;;  %v108_v34 = vsub.s32 %v105_v26, %v3667_v27  ;;  %v3001_v56 = vld [vmem:[#allocation5 + $0x2c] ss:$16 sps:$4 sm:$0xff]  }
  0x62   :  { %797 = vmatpush1.bf16.msra.mxu1 %v2947_v7  ;;  %757 = vmatprep.subr.bf16.mxu0 %v2948_v8  ;;  %v2956_v13 = vld [vmem:[#allocation5 + $0x264] ss:$16 sps:$4 sm:$0xff]   ;;  %v2959_v15 = vld [vmem:[#allocation5 + $0x260] ss:$16 sps:$4 sm:$0xff]   ;;  %v2999_v57 = vld [vmem:[#allocation5 + $0x28] ss:$16 sps:$4 sm:$0xff]  }
  0x63   :  { %798 = vmatprep.subr.bf16.mxu1 %v2950_v9  ;;  %v2960_v16 = vld [vmem:[#allocation5 + $0x84] ss:$16 sps:$4 sm:$0xff]   ;;  %v2964_v18 = vld [vmem:[#allocation5 + $0x80] ss:$16 sps:$4 sm:$0xff]   ;;  %v3670_v38 = vrot.slane %v100_v35, %v108_v34  ;;  %v116_v40 = vrot.slane %v102_v37, %v108_v34  ;;  %v3007_v60 = vld [vmem:[#allocation5 + $0x4c] ss:$16 sps:$4 sm:$0xff]  }
  0x64   :  { %v2962_v17 = vld [vmem:[#allocation5 + $0x284] ss:$16 sps:$4 sm:$0xff]   ;;  %v2965_v19 = vld [vmem:[#allocation5 + $0x280] ss:$16 sps:$4 sm:$0xff]   ;;  %v3005_v61 = vld [vmem:[#allocation5 + $0x48] ss:$16 sps:$4 sm:$0xff]  }
  0x65   :  { %758 = vmatpush1.bf16.msra.mxu0 %v2952_v10  ;;  %v2966_v23 = vld [vmem:[#allocation5 + $0xa4] ss:$16 sps:$4 sm:$0xff]   ;;  %v2970_v25 = vld [vmem:[#allocation5 + $0xa0] ss:$16 sps:$4 sm:$0xff]   ;;  %v117_v41 = vcombine.high %v3670_v38, %v3670_v38  ;;  %v118_v45 = vcombine.high %v116_v40, %v116_v40  ;;  %v3678_v52 = vpack.c.bf16 %v116_v40, %v116_v40  ;;  %v3013_v0 = vld [vmem:[#allocation5 + $0x6c] ss:$16 sps:$4 sm:$0xff]  }
  0x66   :  { %799 = vmatpush1.bf16.msra.mxu1 %v2953_v11  ;;  %759 = vmatprep.subr.bf16.mxu0 %v2954_v12  ;;  %v2968_v24 = vld [vmem:[#allocation5 + $0x2a4] ss:$16 sps:$4 sm:$0xff]   ;;  %v2971_v28 = vld [vmem:[#allocation5 + $0x2a0] ss:$16 sps:$4 sm:$0xff]   ;;  %v3011_v1 = vld [vmem:[#allocation5 + $0x68] ss:$16 sps:$4 sm:$0xff]  }
  0x67   :  { %800 = vmatprep.subr.bf16.mxu1 %v2956_v13  ;;  %v2972_v29 = vld [vmem:[#allocation5 + $0xc4] ss:$16 sps:$4 sm:$0xff]   ;;  %v2976_v31 = vld [vmem:[#allocation5 + $0xc0] ss:$16 sps:$4 sm:$0xff]   ;;  %v124_v46 = vpack.c.bf16 %v117_v41, %v117_v41  ;;  %v3674_v49 = vpack.c.bf16 %v118_v45, %v118_v45  ;;  %v3019_v4 = vld [vmem:[#allocation5 + $0x8c] ss:$16 sps:$4 sm:$0xff]  }
  0x68   :  { %v2974_v30 = vld [vmem:[#allocation5 + $0x2c4] ss:$16 sps:$4 sm:$0xff]   ;;  %v2977_v32 = vld [vmem:[#allocation5 + $0x2c0] ss:$16 sps:$4 sm:$0xff]   ;;  %v3017_v5 = vld [vmem:[#allocation5 + $0x88] ss:$16 sps:$4 sm:$0xff]  }
  0x69   :  { %760 = vmatpush1.bf16.msra.mxu0 %v2958_v14  ;;  %v2978_v33 = vld [vmem:[#allocation5 + $0xe4] ss:$16 sps:$4 sm:$0xff]   ;;  %v2982_v39 = vld [vmem:[#allocation5 + $0xe0] ss:$16 sps:$4 sm:$0xff]   ;;  %785 = vmatprep.mubr.bf16.mxu0 %v124_v46  ;;  %v3025_v8 = vld [vmem:[#allocation5 + $0xac] ss:$16 sps:$4 sm:$0xff]  }
  0x6a   :  { %801 = vmatpush1.bf16.msra.mxu1 %v2959_v15  ;;  %761 = vmatprep.subr.bf16.mxu0 %v2960_v16  ;;  %v2980_v36 = vld [vmem:[#allocation5 + $0x2e4] ss:$16 sps:$4 sm:$0xff]   ;;  %v2983_v42 = vld [vmem:[#allocation5 + $0x2e0] ss:$16 sps:$4 sm:$0xff]   ;;  %v3023_v9 = vld [vmem:[#allocation5 + $0xa8] ss:$16 sps:$4 sm:$0xff]   ;;  %v3683_v16 = vpack.c.bf16 %v3670_v38, %v3670_v38 }
  0x6b   :  { %802 = vmatprep.subr.bf16.mxu1 %v2962_v17  ;;  %v2984_v43 = vld [vmem:[#allocation5 + $0x104] ss:$16 sps:$4 sm:$0xff]   ;;  %v2988_v47 = vld [vmem:[#allocation5 + $0x100] ss:$16 sps:$4 sm:$0xff]   ;;  %2662 = vmatprep.mubr.msk.bf16.mxu1 %vm749_vm0, %v3674_v49  ;;  %v3031_v12 = vld [vmem:[#allocation5 + $0xcc] ss:$16 sps:$4 sm:$0xff]  }
  0x6c   :  { %v2986_v44 = vld [vmem:[#allocation5 + $0x304] ss:$16 sps:$4 sm:$0xff]   ;;  %v2989_v48 = vld [vmem:[#allocation5 + $0x300] ss:$16 sps:$4 sm:$0xff]   ;;  %v3029_v13 = vld [vmem:[#allocation5 + $0xc8] ss:$16 sps:$4 sm:$0xff]  }
  0x6d   :  { %762 = vmatpush1.bf16.msra.mxu0 %v2964_v18  ;;  %v2991_v50 = vld [vmem:[#allocation5 + $0x124] ss:$16 sps:$4 sm:$0xff]   ;;  %v2996_v54 = vld [vmem:[#allocation5 + $0x120] ss:$16 sps:$4 sm:$0xff]   ;;  %v3035_v15 = vld [vmem:[#allocation5 + $0xec] ss:$16 sps:$4 sm:$0xff]  }
  0x6e   :  { %803 = vmatpush1.bf16.msra.mxu1 %v2965_v19  ;;  %763 = vmatprep.subr.bf16.mxu0 %v2966_v23  ;;  %v2997_v55 = vld [vmem:[#allocation5 + $0x144] ss:$16 sps:$4 sm:$0xff]   ;;  %v3002_v58 = vld [vmem:[#allocation5 + $0x140] ss:$16 sps:$4 sm:$0xff]   ;;  %v3033_v17 = vld [vmem:[#allocation5 + $0xe8] ss:$16 sps:$4 sm:$0xff]  }
  0x6f   :  { %804 = vmatprep.subr.bf16.mxu1 %v2968_v24  ;;  %v3003_v59 = vld [vmem:[#allocation5 + $0x164] ss:$16 sps:$4 sm:$0xff]   ;;  %v3008_v62 = vld [vmem:[#allocation5 + $0x160] ss:$16 sps:$4 sm:$0xff]   ;;  %v3038_v18 = vld [vmem:[#allocation5 + $0x10c] ss:$16 sps:$4 sm:$0xff]  }
  0x70   :  { %v3009_v63 = vld [vmem:[#allocation5 + $0x184] ss:$16 sps:$4 sm:$0xff]   ;;  %v3014_v2 = vld [vmem:[#allocation5 + $0x180] ss:$16 sps:$4 sm:$0xff]   ;;  %v3036_v19 = vld [vmem:[#allocation5 + $0x108] ss:$16 sps:$4 sm:$0xff]  }
  0x71   :  { %764 = vmatpush1.bf16.msra.mxu0 %v2970_v25  ;;  %v3015_v3 = vld [vmem:[#allocation5 + $0x1a4] ss:$16 sps:$4 sm:$0xff]   ;;  %v3020_v6 = vld [vmem:[#allocation5 + $0x1a0] ss:$16 sps:$4 sm:$0xff]   ;;  %v3041_v22 = vld [vmem:[#allocation5 + $0x12c] ss:$16 sps:$4 sm:$0xff]  }
  0x72   :  { %805 = vmatpush1.bf16.msra.mxu1 %v2971_v28  ;;  %765 = vmatprep.subr.bf16.mxu0 %v2972_v29  ;;  %v3021_v7 = vld [vmem:[#allocation5 + $0x1c4] ss:$16 sps:$4 sm:$0xff]   ;;  %v3026_v10 = vld [vmem:[#allocation5 + $0x1c0] ss:$16 sps:$4 sm:$0xff]   ;;  %v3039_v25 = vld [vmem:[#allocation5 + $0x128] ss:$16 sps:$4 sm:$0xff]  }
  0x73   :  { %806 = vmatprep.subr.bf16.mxu1 %v2974_v30  ;;  %v3027_v11 = vld [vmem:[#allocation5 + $0x1e4] ss:$16 sps:$4 sm:$0xff]   ;;  %v3032_v14 = vld [vmem:[#allocation5 + $0x1e0] ss:$16 sps:$4 sm:$0xff]   ;;  %v3044_v26 = vld [vmem:[#allocation5 + $0x14c] ss:$16 sps:$4 sm:$0xff]  }
  0x74   :  { %v3087_v20 = vld [vmem:[#allocation7] ss:$16 sps:$4 sm:$0xff]   ;;  %v3089_v21 = vld [vmem:[#allocation7 + $0x4] ss:$16 sps:$4 sm:$0xff]   ;;  %v3042_v29 = vld [vmem:[#allocation5 + $0x148] ss:$16 sps:$4 sm:$0xff]  }
  0x75   :  { %766 = vmatpush1.bf16.msra.mxu0 %v2976_v31  ;;  %v3095_v23 = vld [vmem:[#allocation7 + $0x24] ss:$16 sps:$4 sm:$0xff]   ;;  %v3093_v24 = vld [vmem:[#allocation7 + $0x20] ss:$16 sps:$4 sm:$0xff]   ;;  %v3048_v37 = vld [vmem:[#allocation5 + $0x188] ss:$16 sps:$4 sm:$0xff]  }
  0x76   :  { %807 = vmatpush1.bf16.msra.mxu1 %v2977_v32  ;;  %767 = vmatprep.subr.bf16.mxu0 %v2978_v33  ;;  %v3101_v28 = vld [vmem:[#allocation7 + $0x44] ss:$16 sps:$4 sm:$0xff]   ;;  %v3099_v30 = vld [vmem:[#allocation7 + $0x40] ss:$16 sps:$4 sm:$0xff]   ;;  %v3047_v32 = vld [vmem:[#allocation5 + $0x16c] ss:$16 sps:$4 sm:$0xff]  }
  0x77   :  { %808 = vmatprep.subr.bf16.mxu1 %v2980_v36  ;;  %v3107_v31 = vld [vmem:[#allocation7 + $0x64] ss:$16 sps:$4 sm:$0xff]   ;;  %v3045_v33 = vld [vmem:[#allocation5 + $0x168] ss:$16 sps:$4 sm:$0xff]   ;;  %v3105_v34 = vld [vmem:[#allocation7 + $0x60] ss:$16 sps:$4 sm:$0xff]  }
  0x78   :  { %v3113_v35 = vld [vmem:[#allocation7 + $0x84] ss:$16 sps:$4 sm:$0xff]   ;;  %v3050_v36 = vld [vmem:[#allocation5 + $0x18c] ss:$16 sps:$4 sm:$0xff]   ;;  %v3111_v38 = vld [vmem:[#allocation7 + $0x80] ss:$16 sps:$4 sm:$0xff]  }
  0x79   :  { %768 = vmatpush1.bf16.msra.mxu0 %v2982_v39  ;;  %v3119_v39 = vld [vmem:[#allocation7 + $0xa4] ss:$16 sps:$4 sm:$0xff]   ;;  %v3053_v40 = vld [vmem:[#allocation5 + $0x1ac] ss:$16 sps:$4 sm:$0xff]   ;;  %v3117_v41 = vld [vmem:[#allocation7 + $0xa0] ss:$16 sps:$4 sm:$0xff]  }
  0x7a   :  { %809 = vmatpush1.bf16.msra.mxu1 %v2983_v42  ;;  %769 = vmatprep.subr.bf16.mxu0 %v2984_v43  ;;  %v3051_v42 = vld [vmem:[#allocation5 + $0x1a8] ss:$16 sps:$4 sm:$0xff]   ;;  %v3125_v43 = vld [vmem:[#allocation7 + $0xc4] ss:$16 sps:$4 sm:$0xff]   ;;  %v3123_v45 = vld [vmem:[#allocation7 + $0xc0] ss:$16 sps:$4 sm:$0xff]  }
  0x7b   :  { %810 = vmatprep.subr.bf16.mxu1 %v2986_v44  ;;  %v3056_v44 = vld [vmem:[#allocation5 + $0x1cc] ss:$16 sps:$4 sm:$0xff]  }
  0x7d   :  { %770 = vmatpush1.bf16.msra.mxu0 %v2988_v47  ;;  %v3059_v47 = vld [vmem:[#allocation5 + $0x1ec] ss:$16 sps:$4 sm:$0xff]  }
  0x7e   :  { %811 = vmatpush1.bf16.msra.mxu1 %v2989_v48  ;;  %771 = vmatprep.subr.bf16.mxu0 %v2991_v50  ;;  %v3057_v48 = vld [vmem:[#allocation5 + $0x1e8] ss:$16 sps:$4 sm:$0xff]   ;;  %v3062_v50 = vld [vmem:[#allocation5 + $0x20c] ss:$16 sps:$4 sm:$0xff]  }
  0x7f   :  { %835 = vmatprep.subr.bf16.mxu1 %v2995_v51  ;;  %v3060_v51 = vld [vmem:[#allocation5 + $0x208] ss:$16 sps:$4 sm:$0xff]  }
  0x81   :  { %827 = vmatmul.mubr.bf16.vlgmr.msra.gmra.mrb[0].mxu1 %v3678_v52  ;;  %772 = vmatpush1.bf16.msra.mxu0 %v2996_v54  ;;  %v3063_v54 = vld [vmem:[#allocation5 + $0x228] ss:$16 sps:$4 sm:$0xff]  }
  0x82   :  { %836 = vmatpush1.bf16.msra.mxu1 %v2993_v53  ;;  %773 = vmatprep.subr.bf16.mxu0 %v2997_v55  ;;  %v3065_v53 = vld [vmem:[#allocation5 + $0x22c] ss:$16 sps:$4 sm:$0xff]  }
  0x83   :  { %837 = vmatprep.subr.bf16.mxu1 %v3001_v56  ;;  %867 = vmatprep.mubr.bf16.mxu1 %v124_v46  ;;  %v3054_v46 = vld [vmem:[#allocation5 + $0x1c8] ss:$16 sps:$4 sm:$0xff]   ;;  %v3068_v55 = vld [vmem:[#allocation5 + $0x24c] ss:$16 sps:$4 sm:$0xff]  }
  0x84   :  { %v3066_v56 = vld [vmem:[#allocation5 + $0x248] ss:$16 sps:$4 sm:$0xff]  }
  0x85   :  { %774 = vmatpush1.bf16.msra.mxu0 %v3002_v58  ;;  %v3069_v58 = vld [vmem:[#allocation5 + $0x268] ss:$16 sps:$4 sm:$0xff]  }
  0x86   :  { %838 = vmatpush1.bf16.msra.mxu1 %v2999_v57  ;;  %775 = vmatprep.subr.bf16.mxu0 %v3003_v59  ;;  %v3071_v57 = vld [vmem:[#allocation5 + $0x26c] ss:$16 sps:$4 sm:$0xff]  }
  0x87   :  { %839 = vmatprep.subr.bf16.mxu1 %v3007_v60  ;;  %v3074_v59 = vld [vmem:[#allocation5 + $0x28c] ss:$16 sps:$4 sm:$0xff]   ;;  %v3072_v60 = vld [vmem:[#allocation5 + $0x288] ss:$16 sps:$4 sm:$0xff]  }
  0x89   :  { %776 = vmatpush1.bf16.msra.mxu0 %v3008_v62  ;;  %v3075_v62 = vld [vmem:[#allocation5 + $0x2a8] ss:$16 sps:$4 sm:$0xff]  }
  0x8a   :  { %840 = vmatpush1.bf16.msra.mxu1 %v3005_v61  ;;  %777 = vmatprep.subr.bf16.mxu0 %v3009_v63  ;;  %v3077_v61 = vld [vmem:[#allocation5 + $0x2ac] ss:$16 sps:$4 sm:$0xff]  }
  0x8b   :  { %841 = vmatprep.subr.bf16.mxu1 %v3013_v0  ;;  %v3080_v63 = vld [vmem:[#allocation5 + $0x2cc] ss:$16 sps:$4 sm:$0xff]   ;;  %v3131_v0 = vld [vmem:[#allocation7 + $0xe4] ss:$16 sps:$4 sm:$0xff]  }
  0x8d   :  { %778 = vmatpush1.bf16.msra.mxu0 %v3014_v2  ;;  %v3083_v2 = vld [vmem:[#allocation5 + $0x2ec] ss:$16 sps:$4 sm:$0xff]  }
  0x8e   :  { %842 = vmatpush1.bf16.msra.mxu1 %v3011_v1  ;;  %779 = vmatprep.subr.bf16.mxu0 %v3015_v3  ;;  %v3129_v1 = vld [vmem:[#allocation7 + $0xe0] ss:$16 sps:$4 sm:$0xff]   ;;  %v3137_v3 = vld [vmem:[#allocation7 + $0x104] ss:$16 sps:$4 sm:$0xff]  }
  0x8f   :  { %843 = vmatprep.subr.bf16.mxu1 %v3019_v4  ;;  %v3135_v4 = vld [vmem:[#allocation7 + $0x100] ss:$16 sps:$4 sm:$0xff]  }
  0x91   :  { %780 = vmatpush1.bf16.msra.mxu0 %v3020_v6  ;;  %v3081_v6 = vld [vmem:[#allocation5 + $0x2e8] ss:$16 sps:$4 sm:$0xff]  }
  0x92   :  { %844 = vmatpush1.bf16.msra.mxu1 %v3017_v5  ;;  %781 = vmatprep.subr.bf16.mxu0 %v3021_v7  ;;  %v3143_v5 = vld [vmem:[#allocation7 + $0x124] ss:$16 sps:$4 sm:$0xff]   ;;  %v3086_v7 = vld [vmem:[#allocation5 + $0x30c] ss:$16 sps:$4 sm:$0xff]  }
  0x93   :  { %845 = vmatprep.subr.bf16.mxu1 %v3025_v8  ;;  %v3141_v8 = vld [vmem:[#allocation7 + $0x120] ss:$16 sps:$4 sm:$0xff]  }
  0x95   :  { %782 = vmatpush1.bf16.msra.mxu0 %v3026_v10  ;;  %v3084_v10 = vld [vmem:[#allocation5 + $0x308] ss:$16 sps:$4 sm:$0xff]  }
  0x96   :  { %846 = vmatpush1.bf16.msra.mxu1 %v3023_v9  ;;  %783 = vmatprep.subr.bf16.mxu0 %v3027_v11  ;;  %v3149_v9 = vld [vmem:[#allocation7 + $0x144] ss:$16 sps:$4 sm:$0xff]   ;;  %v3092_v11 = vld [vmem:[#allocation7 + $0xc] ss:$16 sps:$4 sm:$0xff]  }
  0x97   :  { %847 = vmatprep.subr.bf16.mxu1 %v3031_v12  ;;  %v3147_v12 = vld [vmem:[#allocation7 + $0x140] ss:$16 sps:$4 sm:$0xff]  }
  0x99   :  { %784 = vmatpush1.bf16.msra.mxu0 %v3032_v14  ;;  %v3090_v14 = vld [vmem:[#allocation7 + $0x8] ss:$16 sps:$4 sm:$0xff]  }
  0x9a   :  { %848 = vmatpush1.bf16.msra.mxu1 %v3029_v13  ;;  %1715 = vmatprep.subr.bf16.mxu0 %v3089_v21  ;;  %v3155_v13 = vld [vmem:[#allocation7 + $0x164] ss:$16 sps:$4 sm:$0xff]  }
  0x9b   :  { %849 = vmatprep.subr.bf16.mxu1 %v3035_v15  ;;  %v3098_v15 = vld [vmem:[#allocation7 + $0x2c] ss:$16 sps:$4 sm:$0xff]   ;;  %v3167_v21 = vld [vmem:[#allocation7 + $0x1a4] ss:$16 sps:$4 sm:$0xff]  }
  0x9c   :  { %786 = vmatmul.mubr.bf16.vlgmr.msra.gmra.mrb[0].mxu0 %v3683_v16 }
  0x9d   :  { %1716 = vmatpush1.bf16.msra.mxu0 %v3087_v20  ;;  %v3159_v20 = vld [vmem:[#allocation7 + $0x180] ss:$16 sps:$4 sm:$0xff]  }
  0x9e   :  { %850 = vmatpush1.bf16.msra.mxu1 %v3033_v17  ;;  %1717 = vmatprep.subr.bf16.mxu0 %v3095_v23  ;;  %v3161_v17 = vld [vmem:[#allocation7 + $0x184] ss:$16 sps:$4 sm:$0xff]   ;;  %v3110_v23 = vld [vmem:[#allocation7 + $0x6c] ss:$16 sps:$4 sm:$0xff]  }
  0x9f   :  { %851 = vmatprep.subr.bf16.mxu1 %v3038_v18  ;;  %v3096_v18 = vld [vmem:[#allocation7 + $0x28] ss:$16 sps:$4 sm:$0xff]  }
  0xa1   :  { %1718 = vmatpush1.bf16.msra.mxu0 %v3093_v24  ;;  %v3165_v24 = vld [vmem:[#allocation7 + $0x1a0] ss:$16 sps:$4 sm:$0xff]  }
  0xa2   :  { %852 = vmatpush1.bf16.msra.mxu1 %v3036_v19  ;;  %1719 = vmatprep.subr.bf16.mxu0 %v3101_v28  ;;  %v3104_v19 = vld [vmem:[#allocation7 + $0x4c] ss:$16 sps:$4 sm:$0xff]   ;;  %v3173_v28 = vld [vmem:[#allocation7 + $0x1c4] ss:$16 sps:$4 sm:$0xff]  }
  0xa3   :  { %853 = vmatprep.subr.bf16.mxu1 %v3041_v22  ;;  %v3102_v22 = vld [vmem:[#allocation7 + $0x48] ss:$16 sps:$4 sm:$0xff]  }
  0xa5   :  { %1720 = vmatpush1.bf16.msra.mxu0 %v3099_v30  ;;  %v3171_v30 = vld [vmem:[#allocation7 + $0x1c0] ss:$16 sps:$4 sm:$0xff]  }
  0xa6   :  { %854 = vmatpush1.bf16.msra.mxu1 %v3039_v25  ;;  %1721 = vmatprep.subr.bf16.mxu0 %v3107_v31  ;;  %v3108_v25 = vld [vmem:[#allocation7 + $0x68] ss:$16 sps:$4 sm:$0xff]  }
  0xa7   :  { %855 = vmatprep.subr.bf16.mxu1 %v3044_v26  ;;  %v3116_v26 = vld [vmem:[#allocation7 + $0x8c] ss:$16 sps:$4 sm:$0xff]   ;;  %v3120_v31 = vld [vmem:[#allocation7 + $0xa8] ss:$16 sps:$4 sm:$0xff]  }
  0xa9   :  { %1722 = vmatpush1.bf16.msra.mxu0 %v3105_v34  ;;  %v3177_v34 = vld [vmem:[#allocation7 + $0x1e0] ss:$16 sps:$4 sm:$0xff]  }
  0xaa   :  { %856 = vmatpush1.bf16.msra.mxu1 %v3042_v29  ;;  %1723 = vmatprep.subr.bf16.mxu0 %v3113_v35  ;;  %v3122_v29 = vld [vmem:[#allocation7 + $0xac] ss:$16 sps:$4 sm:$0xff]   ;;  %v3126_v35 = vld [vmem:[#allocation7 + $0xc8] ss:$16 sps:$4 sm:$0xff]  }
  0xab   :  { %857 = vmatprep.subr.bf16.mxu1 %v3047_v32  ;;  %v3179_v32 = vld [vmem:[#allocation7 + $0x1e4] ss:$16 sps:$4 sm:$0xff]  }
  0xad   :  { %1724 = vmatpush1.bf16.msra.mxu0 %v3111_v38  ;;  %v3132_v38 = vld [vmem:[#allocation7 + $0xe8] ss:$16 sps:$4 sm:$0xff]  }
  0xae   :  { %858 = vmatpush1.bf16.msra.mxu1 %v3045_v33  ;;  %1725 = vmatprep.subr.bf16.mxu0 %v3119_v39  ;;  %v3128_v33 = vld [vmem:[#allocation7 + $0xcc] ss:$16 sps:$4 sm:$0xff]  }
  0xaf   :  { %859 = vmatprep.subr.bf16.mxu1 %v3050_v36  ;;  %v3134_v36 = vld [vmem:[#allocation7 + $0xec] ss:$16 sps:$4 sm:$0xff]  }
  0xb0   :  { %v3140_v39 = vld [vmem:[#allocation7 + $0x10c] ss:$16 sps:$4 sm:$0xff]  }
  0xb1   :  { %1726 = vmatpush1.bf16.msra.mxu0 %v3117_v41  ;;  %v3146_v41 = vld [vmem:[#allocation7 + $0x12c] ss:$16 sps:$4 sm:$0xff]  }
  0xb2   :  { %860 = vmatpush1.bf16.msra.mxu1 %v3048_v37  ;;  %1727 = vmatprep.subr.bf16.mxu0 %v3125_v43  ;;  %v3185_v37 = vld [vmem:[#allocation7 + $0x204] ss:$16 sps:$4 sm:$0xff]   ;;  %v3152_v43 = vld [vmem:[#allocation7 + $0x14c] ss:$16 sps:$4 sm:$0xff]  }
  0xb3   :  { %861 = vmatprep.subr.bf16.mxu1 %v3053_v40  ;;  %v3138_v40 = vld [vmem:[#allocation7 + $0x108] ss:$16 sps:$4 sm:$0xff]  }
  0xb5   :  { %1728 = vmatpush1.bf16.msra.mxu0 %v3123_v45  ;;  %v3158_v45 = vld [vmem:[#allocation7 + $0x16c] ss:$16 sps:$4 sm:$0xff]  }
  0xb6   :  { %862 = vmatpush1.bf16.msra.mxu1 %v3051_v42  ;;  %1729 = vmatprep.subr.bf16.mxu0 %v3131_v0  ;;  %v3144_v42 = vld [vmem:[#allocation7 + $0x128] ss:$16 sps:$4 sm:$0xff]   ;;  %v3699_v0 = vsub.s32 1, %v3667_v27 }
  0xb7   :  { %863 = vmatprep.subr.bf16.mxu1 %v3056_v44  ;;  %v3150_v44 = vld [vmem:[#allocation7 + $0x148] ss:$16 sps:$4 sm:$0xff]  }
  0xb9   :  { %1730 = vmatpush1.bf16.msra.mxu0 %v3129_v1 }
  0xba   :  { %864 = vmatpush1.bf16.msra.mxu1 %v3054_v46  ;;  %1731 = vmatprep.subr.bf16.mxu0 %v3137_v3  ;;  %v3156_v46 = vld [vmem:[#allocation7 + $0x168] ss:$16 sps:$4 sm:$0xff]  }
  0xbb   :  { %865 = vmatprep.subr.bf16.mxu1 %v3059_v47  ;;  %v3164_v47 = vld [vmem:[#allocation7 + $0x18c] ss:$16 sps:$4 sm:$0xff]  }
  0xbd   :  { %1732 = vmatpush1.bf16.msra.mxu0 %v3135_v4 }
  0xbe   :  { %866 = vmatpush1.bf16.msra.mxu1 %v3057_v48  ;;  %1733 = vmatprep.subr.bf16.mxu0 %v3143_v5  ;;  %v3162_v48 = vld [vmem:[#allocation7 + $0x188] ss:$16 sps:$4 sm:$0xff]  }
  0xbf   :  { %876 = vmatprep.subr.bf16.mxu1 %v3062_v50  ;;  %v3170_v50 = vld [vmem:[#allocation7 + $0x1ac] ss:$16 sps:$4 sm:$0xff]  }
  0xc1   :  { %868 = vmatmul.mubr.bf16.vlgmr.msra.gmra.mrb[4].mxu1 %v3683_v16  ;;  %1734 = vmatpush1.bf16.msra.mxu0 %v3141_v8  ;;  %v3153_v16 = vld [vmem:[#allocation7 + $0x160] ss:$16 sps:$4 sm:$0xff]  }
  0xc2   :  { %877 = vmatpush1.bf16.msra.mxu1 %v3060_v51  ;;  %2663 = vmatprep.mubr.msk.bf16.mxu1 %vm749_vm0, %v3674_v49  ;;  %v3078_v49 = vld [vmem:[#allocation5 + $0x2c8] ss:$16 sps:$4 sm:$0xff]  }
  0xc3   :  { %878 = vmatprep.subr.bf16.mxu1 %v3065_v53  ;;  %1735 = vmatprep.subr.bf16.mxu0 %v3149_v9  ;;  %v3168_v51 = vld [vmem:[#allocation7 + $0x1a8] ss:$16 sps:$4 sm:$0xff]   ;;  %v3176_v53 = vld [vmem:[#allocation7 + $0x1cc] ss:$16 sps:$4 sm:$0xff]  }
  0xc5   :  { %1736 = vmatpush1.bf16.msra.mxu0 %v3147_v12 }
  0xc6   :  { %879 = vmatpush1.bf16.msra.mxu1 %v3063_v54  ;;  %1737 = vmatprep.subr.bf16.mxu0 %v3155_v13  ;;  %v3174_v54 = vld [vmem:[#allocation7 + $0x1c8] ss:$16 sps:$4 sm:$0xff]   ;;  %v3183_v13 = vld [vmem:[#allocation7 + $0x200] ss:$16 sps:$4 sm:$0xff]  }
  0xc7   :  { %880 = vmatprep.subr.bf16.mxu1 %v3068_v55  ;;  %v3182_v55 = vld [vmem:[#allocation7 + $0x1ec] ss:$16 sps:$4 sm:$0xff]  }
  0xc9   :  { %1738 = vmatpush1.bf16.msra.mxu0 %v3153_v16  ;;  %v3191_v16 = vld [vmem:[#allocation7 + $0x224] ss:$16 sps:$4 sm:$0xff]  }
  0xca   :  { %881 = vmatpush1.bf16.msra.mxu1 %v3066_v56  ;;  %1739 = vmatprep.subr.bf16.mxu0 %v3161_v17  ;;  %v3180_v56 = vld [vmem:[#allocation7 + $0x1e8] ss:$16 sps:$4 sm:$0xff]   ;;  %v3194_v17 = vld [vmem:[#allocation7 + $0x22c] ss:$16 sps:$4 sm:$0xff]  }
  0xcb   :  { %882 = vmatprep.subr.bf16.mxu1 %v3071_v57  ;;  %v3188_v57 = vld [vmem:[#allocation7 + $0x20c] ss:$16 sps:$4 sm:$0xff]  }
  0xcd   :  { %1740 = vmatpush1.bf16.msra.mxu0 %v3159_v20  ;;  %v3197_v20 = vld [vmem:[#allocation7 + $0x244] ss:$16 sps:$4 sm:$0xff]  }
  0xce   :  { %883 = vmatpush1.bf16.msra.mxu1 %v3069_v58  ;;  %1741 = vmatprep.subr.bf16.mxu0 %v3167_v21  ;;  %v3200_v21 = vld [vmem:[#allocation7 + $0x24c] ss:$16 sps:$4 sm:$0xff]  }
  0xcf   :  { %884 = vmatprep.subr.bf16.mxu1 %v3074_v59 }
  0xd1   :  { %1742 = vmatpush1.bf16.msra.mxu0 %v3165_v24  ;;  %v3203_v24 = vld [vmem:[#allocation7 + $0x264] ss:$16 sps:$4 sm:$0xff]  }
  0xd2   :  { %885 = vmatpush1.bf16.msra.mxu1 %v3072_v60  ;;  %1743 = vmatprep.subr.bf16.mxu0 %v3173_v28  ;;  %v3209_v28 = vld [vmem:[#allocation7 + $0x284] ss:$16 sps:$4 sm:$0xff]  }
  0xd3   :  { %886 = vmatprep.subr.bf16.mxu1 %v3077_v61 }
  0xd5   :  { %1744 = vmatpush1.bf16.msra.mxu0 %v3171_v30  ;;  %v3207_v30 = vld [vmem:[#allocation7 + $0x280] ss:$16 sps:$4 sm:$0xff]  }
  0xd6   :  { %887 = vmatpush1.bf16.msra.mxu1 %v3075_v62  ;;  %1745 = vmatprep.subr.bf16.mxu0 %v3179_v32  ;;  %v3691_v62 = vsub.s32 0, %v3667_v27  ;;  %v3215_v32 = vld [vmem:[#allocation7 + $0x2a4] ss:$16 sps:$4 sm:$0xff]  }
  0xd7   :  { %888 = vmatprep.subr.bf16.mxu1 %v3080_v63  ;;  %v3696_v63 = vld [vmem:[%s3753_s2] sm:$0xf] }
  0xd8   :  { %v236_v1 = vrot.slane %v3696_v63, %v3699_v0 }
  0xd9   :  { %1746 = vmatpush1.bf16.msra.mxu0 %v3177_v34  ;;  %v3213_v34 = vld [vmem:[#allocation7 + $0x2a0] ss:$16 sps:$4 sm:$0xff]  }
  0xda   :  { %889 = vmatpush1.bf16.msra.mxu1 %v3078_v49  ;;  %1756 = vmatprep.subr.bf16.mxu0 %v3185_v37  ;;  %v232_v49 = vrot.slane %v3696_v63, %v3691_v62  ;;  %v3224_v37 = vld [vmem:[#allocation7 + $0x2cc] ss:$16 sps:$4 sm:$0xff]  }
  0xdb   :  { %890 = vmatprep.subr.bf16.mxu1 %v3083_v2 }
  0xde   :  { %891 = vmatpush1.bf16.msra.mxu1 %v3081_v6 }
  0xdf   :  { %892 = vmatprep.subr.bf16.mxu1 %v3086_v7 }
  0xe2   :  { %893 = vmatpush1.bf16.msra.mxu1 %v3084_v10 }
  0xe3   :  { %1797 = vmatprep.subr.bf16.mxu1 %v3092_v11 }
  0xe5   :  { %909 = vmatmul.mubr.bf16.vlgmr.msra.gmra.mrb[4].mxu1 %v3678_v52  ;;  %v3114_v52 = vld [vmem:[#allocation7 + $0x88] ss:$16 sps:$4 sm:$0xff]  }
  0xe6   :  { %1798 = vmatpush1.bf16.msra.mxu1 %v3090_v14  ;;  %v3186_v14 = vld [vmem:[#allocation7 + $0x208] ss:$16 sps:$4 sm:$0xff]  }
  0xe7   :  { %1799 = vmatprep.subr.bf16.mxu1 %v3098_v15 }
  0xea   :  { %1800 = vmatpush1.bf16.msra.mxu1 %v3096_v18  ;;  %v3189_v18 = vld [vmem:[#allocation7 + $0x220] ss:$16 sps:$4 sm:$0xff]  }
  0xeb   :  { %1801 = vmatprep.subr.bf16.mxu1 %v3104_v19  ;;  %v3192_v19 = vld [vmem:[#allocation7 + $0x228] ss:$16 sps:$4 sm:$0xff]  }
  0xee   :  { %1802 = vmatpush1.bf16.msra.mxu1 %v3102_v22  ;;  %v3195_v22 = vld [vmem:[#allocation7 + $0x240] ss:$16 sps:$4 sm:$0xff]  }
  0xef   :  { %1803 = vmatprep.subr.bf16.mxu1 %v3110_v23  ;;  %v3198_v23 = vld [vmem:[#allocation7 + $0x248] ss:$16 sps:$4 sm:$0xff]  }
  0xf2   :  { %1804 = vmatpush1.bf16.msra.mxu1 %v3108_v25  ;;  %v3206_v25 = vld [vmem:[#allocation7 + $0x26c] ss:$16 sps:$4 sm:$0xff]  }
  0xf3   :  { %1805 = vmatprep.subr.bf16.mxu1 %v3116_v26  ;;  %v3201_v26 = vld [vmem:[#allocation7 + $0x260] ss:$16 sps:$4 sm:$0xff]  }
  0xf6   :  { %1806 = vmatpush1.bf16.msra.mxu1 %v3114_v52  ;;  %v3204_v52 = vld [vmem:[#allocation7 + $0x268] ss:$16 sps:$4 sm:$0xff]  }
  0xf7   :  { %1807 = vmatprep.subr.bf16.mxu1 %v3122_v29  ;;  %v3212_v29 = vld [vmem:[#allocation7 + $0x28c] ss:$16 sps:$4 sm:$0xff]  }
  0xfa   :  { %1808 = vmatpush1.bf16.msra.mxu1 %v3120_v31  ;;  %v3210_v31 = vld [vmem:[#allocation7 + $0x288] ss:$16 sps:$4 sm:$0xff]  }
  0xfb   :  { %1809 = vmatprep.subr.bf16.mxu1 %v3128_v33  ;;  %v3218_v33 = vld [vmem:[#allocation7 + $0x2ac] ss:$16 sps:$4 sm:$0xff]  }
  0xfe   :  { %1810 = vmatpush1.bf16.msra.mxu1 %v3126_v35  ;;  %v3216_v35 = vld [vmem:[#allocation7 + $0x2a8] ss:$16 sps:$4 sm:$0xff]  }
  0xff   :  { %1811 = vmatprep.subr.bf16.mxu1 %v3134_v36  ;;  %v3221_v36 = vld [vmem:[#allocation7 + $0x2c4] ss:$16 sps:$4 sm:$0xff]  }
 0x102   :  { %1812 = vmatpush1.bf16.msra.mxu1 %v3132_v38  ;;  %v3219_v38 = vld [vmem:[#allocation7 + $0x2c0] ss:$16 sps:$4 sm:$0xff]  }
 0x103   :  { %1813 = vmatprep.subr.bf16.mxu1 %v3140_v39  ;;  %v3222_v39 = vld [vmem:[#allocation7 + $0x2c8] ss:$16 sps:$4 sm:$0xff]  }
 0x106   :  { %1814 = vmatpush1.bf16.msra.mxu1 %v3138_v40  ;;  %v3227_v40 = vld [vmem:[#allocation7 + $0x2e4] ss:$16 sps:$4 sm:$0xff]  }
 0x107   :  { %1815 = vmatprep.subr.bf16.mxu1 %v3146_v41  ;;  %v3230_v41 = vld [vmem:[#allocation7 + $0x2ec] ss:$16 sps:$4 sm:$0xff]  }
 0x10a   :  { %1816 = vmatpush1.bf16.msra.mxu1 %v3144_v42  ;;  %v3225_v42 = vld [vmem:[#allocation7 + $0x2e0] ss:$16 sps:$4 sm:$0xff]  }
 0x10b   :  { %1817 = vmatprep.subr.bf16.mxu1 %v3152_v43  ;;  %v3228_v43 = vld [vmem:[#allocation7 + $0x2e8] ss:$16 sps:$4 sm:$0xff]  }
 0x10e   :  { %1818 = vmatpush1.bf16.msra.mxu1 %v3150_v44  ;;  %v3233_v44 = vld [vmem:[#allocation7 + $0x304] ss:$16 sps:$4 sm:$0xff]  }
 0x10f   :  { %1819 = vmatprep.subr.bf16.mxu1 %v3158_v45  ;;  %v3236_v45 = vld [vmem:[#allocation7 + $0x30c] ss:$16 sps:$4 sm:$0xff]  }
 0x112   :  { %1820 = vmatpush1.bf16.msra.mxu1 %v3156_v46  ;;  %v3231_v46 = vld [vmem:[#allocation7 + $0x300] ss:$16 sps:$4 sm:$0xff]  }
 0x113   :  { %1821 = vmatprep.subr.bf16.mxu1 %v3164_v47  ;;  %v3234_v47 = vld [vmem:[#allocation7 + $0x308] ss:$16 sps:$4 sm:$0xff]  }
 0x116   :  { %1822 = vmatpush1.bf16.msra.mxu1 %v3162_v48  ;;  %v3239_v48 = vld [vmem:[#allocation7 + $0x324] ss:$16 sps:$4 sm:$0xff]  }
 0x117   :  { %1823 = vmatprep.subr.bf16.mxu1 %v3170_v50  ;;  %v3242_v50 = vld [vmem:[#allocation7 + $0x32c] ss:$16 sps:$4 sm:$0xff]  }
 0x11a   :  { %1824 = vmatpush1.bf16.msra.mxu1 %v3168_v51  ;;  %v3237_v51 = vld [vmem:[#allocation7 + $0x320] ss:$16 sps:$4 sm:$0xff]  }
 0x11b   :  { %1825 = vmatprep.subr.bf16.mxu1 %v3176_v53  ;;  %v3240_v53 = vld [vmem:[#allocation7 + $0x328] ss:$16 sps:$4 sm:$0xff]  }
 0x11e   :  { %1826 = vmatpush1.bf16.msra.mxu1 %v3174_v54  ;;  %v3245_v54 = vld [vmem:[#allocation7 + $0x344] ss:$16 sps:$4 sm:$0xff]  }
 0x11f   :  { %1827 = vmatprep.subr.bf16.mxu1 %v3182_v55  ;;  %v3248_v55 = vld [vmem:[#allocation7 + $0x34c] ss:$16 sps:$4 sm:$0xff]  }
 0x122   :  { %1828 = vmatpush1.bf16.msra.mxu1 %v3180_v56  ;;  %v3243_v56 = vld [vmem:[#allocation7 + $0x340] ss:$16 sps:$4 sm:$0xff]  }
 0x123   :  { %1838 = vmatprep.subr.bf16.mxu1 %v3188_v57  ;;  %v3246_v57 = vld [vmem:[#allocation7 + $0x348] ss:$16 sps:$4 sm:$0xff]  }
 0x154   :  { %v828_v58 = vpop.f32.mrb[0].mxu1 }
 0x155   :  { %v830_v59 = vpop.f32.mrb[1].mxu1 }
 0x156   :  { %v832_v60 = vpop.f32.mrb[2].mxu1 }
 0x157   :  { %v833_v61 = vpop.f32.mrb[3].mxu1  ;;  %v3249_v60 = vld [vmem:[#allocation7 + $0x360] ss:$16 sps:$4 sm:$0xff]  }
 0x158   :  { %v3252_v61 = vld [vmem:[#allocation7 + $0x368] ss:$16 sps:$4 sm:$0xff]  }
 0x16f   :  { %v787_v2 = vpop.f32.mrb[0].mxu0 }
 0x170   :  { %v788_v3 = vadd.f32 %v787_v2, %v232_v49  ;;  %v789_v4 = vpop.f32.mrb[1].mxu0  ;;  %v3257_v49 = vld [vmem:[#allocation7 + $0x384] ss:$16 sps:$4 sm:$0xff]   ;;  %v3255_v2 = vld [vmem:[#allocation7 + $0x380] ss:$16 sps:$4 sm:$0xff]  }
 0x171   :  { %v790_v5 = vadd.f32 %v789_v4, %v236_v1  ;;  %v791_v6 = vpop.f32.mrb[2].mxu0  ;;  %v3260_v1 = vld [vmem:[#allocation7 + $0x38c] ss:$16 sps:$4 sm:$0xff]   ;;  %v3263_v4 = vld [vmem:[#allocation7 + $0x3a4] ss:$16 sps:$4 sm:$0xff]  }
 0x172   :  { %v829_v7 = vadd.f32 %v828_v58, %v788_v3  ;;  %v792_v8 = vpop.f32.mrb[3].mxu0  ;;  %v3251_v58 = vld [vmem:[#allocation7 + $0x364] ss:$16 sps:$4 sm:$0xff]   ;;  %v3258_v3 = vld [vmem:[#allocation7 + $0x388] ss:$16 sps:$4 sm:$0xff]  }
 0x173   :  { %v831_v9 = vadd.f32 %v830_v59, %v790_v5  ;;  %v3254_v59 = vld [vmem:[#allocation7 + $0x36c] ss:$16 sps:$4 sm:$0xff]   ;;  %v3261_v6 = vld [vmem:[#allocation7 + $0x3a0] ss:$16 sps:$4 sm:$0xff]   ;;  %v3269_v8 = vld [vmem:[#allocation7 + $0x3c4] ss:$16 sps:$4 sm:$0xff]  }
 0x174   :  { %v917_v10 = vmax.f32 %v829_v7, 0.0  ;;  %v3266_v5 = vld [vmem:[#allocation7 + $0x3ac] ss:$16 sps:$4 sm:$0xff]   ;;  %v3264_v7 = vld [vmem:[#allocation7 + $0x3a8] ss:$16 sps:$4 sm:$0xff]  }
 0x175   :  { %v918_v11 = vmax.f32 %v831_v9, 0.0  ;;  %v3272_v9 = vld [vmem:[#allocation7 + $0x3cc] ss:$16 sps:$4 sm:$0xff]  }
 0x176   :  { %v921_v15 = vpack.c.bf16 %v917_v10, %v917_v10  ;;  %v3267_v10 = vld [vmem:[#allocation7 + $0x3c0] ss:$16 sps:$4 sm:$0xff]  }
 0x177   :  { %v922_v12 = vpack.c.bf16 %v918_v11, %v918_v11  ;;  %v3270_v11 = vld [vmem:[#allocation7 + $0x3c8] ss:$16 sps:$4 sm:$0xff]  }
 0x179   :  { %1747 = vmatprep.mubr.bf16.mxu0 %v922_v12  ;;  %1829 = vmatprep.mubr.bf16.mxu1 %v922_v12  ;;  %v239_v12 = vsub.s32 2, %v3667_v27 }
 0x17a   :  { %1748 = vmatmul.mubr.bf16.vlgmr.msra.gmra.mrb[4].mxu0 %v921_v15  ;;  %1830 = vmatmul.mubr.bf16.vlgmr.msra.gmra.mrb[8].mxu1 %v921_v15  ;;  %v243_v15 = vsub.s32 3, %v3667_v27  ;;  %v3389_v27 = vld [vmem:[#allocation10 + $0x78] sm:$0xff]  }
 0x17b   :  { %1757 = vmatpush1.bf16.msra.mxu0 %v3183_v13  ;;  %1839 = vmatpush1.bf16.msra.mxu1 %v3186_v14  ;;  %v3275_v13 = vld [vmem:[#allocation7 + $0x3e4] ss:$16 sps:$4 sm:$0xff]   ;;  %v3278_v14 = vld [vmem:[#allocation7 + $0x3ec] ss:$16 sps:$4 sm:$0xff]  }
 0x17c   :  { %1758 = vmatprep.subr.bf16.mxu0 %v3191_v16  ;;  %1840 = vmatprep.subr.bf16.mxu1 %v3194_v17  ;;  %v3273_v16 = vld [vmem:[#allocation7 + $0x3e0] ss:$16 sps:$4 sm:$0xff]   ;;  %v3276_v17 = vld [vmem:[#allocation7 + $0x3e8] ss:$16 sps:$4 sm:$0xff]  }
 0x17f   :  { %1759 = vmatpush1.bf16.msra.mxu0 %v3189_v18  ;;  %1841 = vmatpush1.bf16.msra.mxu1 %v3192_v19  ;;  %v240_v18 = vrot.slane %v3696_v63, %v239_v12  ;;  %v3281_v19 = vld [vmem:[#allocation8 + $0x4] ss:$8 sps:$4 sm:$0xff]  }
 0x180   :  { %1760 = vmatprep.subr.bf16.mxu0 %v3197_v20  ;;  %1842 = vmatprep.subr.bf16.mxu1 %v3200_v21  ;;  %v244_v20 = vrot.slane %v3696_v63, %v243_v15  ;;  %v3282_v63 = vld [vmem:[#allocation8 + $0x10] ss:$8 sps:$4 sm:$0xff]  }
 0x183   :  { %1761 = vmatpush1.bf16.msra.mxu0 %v3195_v22  ;;  %1843 = vmatpush1.bf16.msra.mxu1 %v3198_v23 }
 0x184   :  { %1762 = vmatprep.subr.bf16.mxu0 %v3203_v24  ;;  %1844 = vmatprep.subr.bf16.mxu1 %v3206_v25 }
 0x187   :  { %1763 = vmatpush1.bf16.msra.mxu0 %v3201_v26  ;;  %1845 = vmatpush1.bf16.msra.mxu1 %v3204_v52 }
 0x188   :  { %1764 = vmatprep.subr.bf16.mxu0 %v3209_v28  ;;  %1846 = vmatprep.subr.bf16.mxu1 %v3212_v29 }
 0x18b   :  { %1765 = vmatpush1.bf16.msra.mxu0 %v3207_v30  ;;  %1847 = vmatpush1.bf16.msra.mxu1 %v3210_v31  ;;  %v3279_v30 = vld [vmem:[#allocation8] ss:$8 sps:$4 sm:$0xff]  }
 0x18c   :  { %1766 = vmatprep.subr.bf16.mxu0 %v3215_v32  ;;  %1848 = vmatprep.subr.bf16.mxu1 %v3218_v33  ;;  %v3284_v32 = vld [vmem:[#allocation8 + $0x14] ss:$8 sps:$4 sm:$0xff]   ;;  %v3287_v33 = vld [vmem:[#allocation8 + $0x24] ss:$8 sps:$4 sm:$0xff]  }
 0x18f   :  { %1767 = vmatpush1.bf16.msra.mxu0 %v3213_v34  ;;  %1849 = vmatpush1.bf16.msra.mxu1 %v3216_v35  ;;  %v3285_v34 = vld [vmem:[#allocation8 + $0x20] ss:$8 sps:$4 sm:$0xff]   ;;  %v3290_v35 = vld [vmem:[#allocation8 + $0x34] ss:$8 sps:$4 sm:$0xff]  }
 0x190   :  { %1768 = vmatprep.subr.bf16.mxu0 %v3221_v36  ;;  %1850 = vmatprep.subr.bf16.mxu1 %v3224_v37  ;;  %v3288_v36 = vld [vmem:[#allocation8 + $0x30] ss:$8 sps:$4 sm:$0xff]   ;;  %v3293_v37 = vld [vmem:[#allocation8 + $0x44] ss:$8 sps:$4 sm:$0xff]  }
 0x193   :  { %1769 = vmatpush1.bf16.msra.mxu0 %v3219_v38  ;;  %1851 = vmatpush1.bf16.msra.mxu1 %v3222_v39  ;;  %v3291_v38 = vld [vmem:[#allocation8 + $0x40] ss:$8 sps:$4 sm:$0xff]   ;;  %v3296_v39 = vld [vmem:[#allocation8 + $0x54] ss:$8 sps:$4 sm:$0xff]  }
 0x194   :  { %1770 = vmatprep.subr.bf16.mxu0 %v3227_v40  ;;  %1852 = vmatprep.subr.bf16.mxu1 %v3230_v41  ;;  %v3294_v40 = vld [vmem:[#allocation8 + $0x50] ss:$8 sps:$4 sm:$0xff]   ;;  %v3299_v41 = vld [vmem:[#allocation8 + $0x64] ss:$8 sps:$4 sm:$0xff]  }
 0x197   :  { %1771 = vmatpush1.bf16.msra.mxu0 %v3225_v42  ;;  %1853 = vmatpush1.bf16.msra.mxu1 %v3228_v43  ;;  %v3297_v42 = vld [vmem:[#allocation8 + $0x60] ss:$8 sps:$4 sm:$0xff]   ;;  %v3302_v43 = vld [vmem:[#allocation8 + $0x74] ss:$8 sps:$4 sm:$0xff]  }
 0x198   :  { %1772 = vmatprep.subr.bf16.mxu0 %v3233_v44  ;;  %1854 = vmatprep.subr.bf16.mxu1 %v3236_v45  ;;  %v3300_v44 = vld [vmem:[#allocation8 + $0x70] ss:$8 sps:$4 sm:$0xff]   ;;  %v3305_v45 = vld [vmem:[#allocation8 + $0x84] ss:$8 sps:$4 sm:$0xff]  }
 0x19b   :  { %1773 = vmatpush1.bf16.msra.mxu0 %v3231_v46  ;;  %1855 = vmatpush1.bf16.msra.mxu1 %v3234_v47  ;;  %v3303_v46 = vld [vmem:[#allocation8 + $0x80] ss:$8 sps:$4 sm:$0xff]   ;;  %v3308_v47 = vld [vmem:[#allocation8 + $0x94] ss:$8 sps:$4 sm:$0xff]  }
 0x19c   :  { %1774 = vmatprep.subr.bf16.mxu0 %v3239_v48  ;;  %1856 = vmatprep.subr.bf16.mxu1 %v3242_v50  ;;  %v3306_v48 = vld [vmem:[#allocation8 + $0x90] ss:$8 sps:$4 sm:$0xff]   ;;  %v3311_v50 = vld [vmem:[#allocation8 + $0xa4] ss:$8 sps:$4 sm:$0xff]  }
 0x19f   :  { %1775 = vmatpush1.bf16.msra.mxu0 %v3237_v51  ;;  %1857 = vmatpush1.bf16.msra.mxu1 %v3240_v53  ;;  %v3309_v51 = vld [vmem:[#allocation8 + $0xa0] ss:$8 sps:$4 sm:$0xff]   ;;  %v3314_v53 = vld [vmem:[#allocation8 + $0xb4] ss:$8 sps:$4 sm:$0xff]  }
 0x1a0   :  { %1776 = vmatprep.subr.bf16.mxu0 %v3245_v54  ;;  %1858 = vmatprep.subr.bf16.mxu1 %v3248_v55  ;;  %v3312_v54 = vld [vmem:[#allocation8 + $0xb0] ss:$8 sps:$4 sm:$0xff]   ;;  %v3317_v55 = vld [vmem:[#allocation8 + $0xc4] ss:$8 sps:$4 sm:$0xff]  }
 0x1a3   :  { %1777 = vmatpush1.bf16.msra.mxu0 %v3243_v56  ;;  %1859 = vmatpush1.bf16.msra.mxu1 %v3246_v57  ;;  %v3315_v56 = vld [vmem:[#allocation8 + $0xc0] ss:$8 sps:$4 sm:$0xff]   ;;  %v3320_v57 = vld [vmem:[#allocation8 + $0xd4] ss:$8 sps:$4 sm:$0xff]  }
 0x1a4   :  { %1778 = vmatprep.subr.bf16.mxu0 %v3251_v58  ;;  %1860 = vmatprep.subr.bf16.mxu1 %v3254_v59  ;;  %v3318_v58 = vld [vmem:[#allocation8 + $0xd0] ss:$8 sps:$4 sm:$0xff]   ;;  %v3323_v59 = vld [vmem:[#allocation8 + $0xe4] ss:$8 sps:$4 sm:$0xff]  }
 0x1a7   :  { %1779 = vmatpush1.bf16.msra.mxu0 %v3249_v60  ;;  %1861 = vmatpush1.bf16.msra.mxu1 %v3252_v61  ;;  %v3321_v60 = vld [vmem:[#allocation8 + $0xe0] ss:$8 sps:$4 sm:$0xff]   ;;  %v3326_v61 = vld [vmem:[#allocation8 + $0xf4] ss:$8 sps:$4 sm:$0xff]  }
 0x1a8   :  { %1780 = vmatprep.subr.bf16.mxu0 %v3257_v49  ;;  %1862 = vmatprep.subr.bf16.mxu1 %v3260_v1  ;;  %v3324_v49 = vld [vmem:[#allocation8 + $0xf0] ss:$8 sps:$4 sm:$0xff]   ;;  %v3329_v1 = vld [vmem:[#allocation8 + $0x104] ss:$8 sps:$4 sm:$0xff]  }
 0x1ab   :  { %1781 = vmatpush1.bf16.msra.mxu0 %v3255_v2  ;;  %1863 = vmatpush1.bf16.msra.mxu1 %v3258_v3  ;;  %v3375_v2 = vld [vmem:[#allocation10 + $0x40] sm:$0xff]  }
 0x1ac   :  { %1782 = vmatprep.subr.bf16.mxu0 %v3263_v4  ;;  %1864 = vmatprep.subr.bf16.mxu1 %v3266_v5  ;;  %v3376_v3 = vld [vmem:[#allocation10] sm:$0xff]   ;;  %v3377_v4 = vld [vmem:[#allocation10 + $0x48] sm:$0xff]  }
 0x1ad   :  { %v3378_v5 = vld [vmem:[#allocation10 + $0x8] sm:$0xff]  }
 0x1af   :  { %1783 = vmatpush1.bf16.msra.mxu0 %v3261_v6  ;;  %1865 = vmatpush1.bf16.msra.mxu1 %v3264_v7  ;;  %v3379_v6 = vld [vmem:[#allocation10 + $0x50] sm:$0xff]  }
 0x1b0   :  { %1784 = vmatprep.subr.bf16.mxu0 %v3269_v8  ;;  %1866 = vmatprep.subr.bf16.mxu1 %v3272_v9  ;;  %v3380_v7 = vld [vmem:[#allocation10 + $0x10] sm:$0xff]   ;;  %v3381_v8 = vld [vmem:[#allocation10 + $0x58] sm:$0xff]  }
 0x1b1   :  { %v3382_v9 = vld [vmem:[#allocation10 + $0x18] sm:$0xff]  }
 0x1b3   :  { %1785 = vmatpush1.bf16.msra.mxu0 %v3267_v10  ;;  %1867 = vmatpush1.bf16.msra.mxu1 %v3270_v11  ;;  %v3383_v10 = vld [vmem:[#allocation10 + $0x60] sm:$0xff]  }
 0x1b4   :  { %1786 = vmatprep.subr.bf16.mxu0 %v3275_v13  ;;  %1868 = vmatprep.subr.bf16.mxu1 %v3278_v14  ;;  %v3384_v11 = vld [vmem:[#allocation10 + $0x20] sm:$0xff]   ;;  %v3385_v13 = vld [vmem:[#allocation10 + $0x68] sm:$0xff]  }
 0x1b5   :  { %v3386_v14 = vld [vmem:[#allocation10 + $0x28] sm:$0xff]  }
 0x1b7   :  { %1787 = vmatpush1.bf16.msra.mxu0 %v3273_v16  ;;  %1869 = vmatpush1.bf16.msra.mxu1 %v3276_v17  ;;  %v3716_v16 = vld [vmem:[%s3755_s4] sm:$0xf] }
 0x1b8   :  { %v910_v21 = vpop.f32.mrb[4].mxu1  ;;  %2283 = vmatprep.subr.bf16.mxu0 %v3281_v19  ;;  %2873 = vmatprep.subr.bf16.mxu1 %v3375_v2  ;;  %v1058_v17 = vrot.slane %v3716_v16, %v3691_v62  ;;  %v1070_v19 = vrot.slane %v3716_v16, %v243_v15  ;;  %v1066_v2 = vrot.slane %v3716_v16, %v239_v12  ;;  %v3390_v12 = vld [vmem:[#allocation10 + $0x38] sm:$0xff]  }
 0x1b9   :  { %v2899_v22 = vadd.f32 %v910_v21, %v240_v18  ;;  %v912_v23 = vpop.f32.mrb[5].mxu1  ;;  %v1062_v18 = vrot.slane %v3716_v16, %v3699_v0 }
 0x1ba   :  { %v2900_v24 = vadd.f32 %v912_v23, %v244_v20  ;;  %v914_v25 = vpop.f32.mrb[6].mxu1 }
 0x1bb   :  { %v919_v26 = vmax.f32 %v2899_v22, 0.0  ;;  %v915_v52 = vpop.f32.mrb[7].mxu1 }
 0x1bc   :  { %v920_v28 = vmax.f32 %v2900_v24, 0.0 }
 0x1bd   :  { %v923_v31 = vpack.c.bf16 %v919_v26, %v919_v26 }
 0x1be   :  { %v924_v29 = vpack.c.bf16 %v920_v28, %v920_v28 }
 0x1c0   :  { %1788 = vmatprep.mubr.bf16.mxu0 %v924_v29  ;;  %1870 = vmatprep.mubr.bf16.mxu1 %v924_v29 }
 0x1c1   :  { %1789 = vmatmul.mubr.bf16.vlgmr.msra.gmra.mrb[4].mxu0 %v923_v31  ;;  %1871 = vmatmul.mubr.bf16.vlgmr.msra.gmra.mrb[8].mxu1 %v923_v31 }
 0x1c2   :  { %2284 = vmatpush1.bf16.msra.mxu0 %v3279_v30  ;;  %2874 = vmatpush3.bf16.msra.mxu1 %v3376_v3  ;;  %v3371_v3 = vld [vmem:[#allocation8 + $0x1e4] ss:$8 sps:$4 sm:$0xff]  }
 0x1c3   :  { %2285 = vmatprep.subr.bf16.mxu0 %v3284_v32  ;;  %2875 = vmatprep.subr.bf16.mxu1 %v3377_v4  ;;  %v3369_v4 = vld [vmem:[#allocation8 + $0x1e0] ss:$8 sps:$4 sm:$0xff]  }
 0x1c6   :  { %2286 = vmatpush1.bf16.msra.mxu0 %v3282_v63  ;;  %2876 = vmatpush3.bf16.msra.mxu1 %v3378_v5 }
 0x1c7   :  { %2287 = vmatprep.subr.bf16.mxu0 %v3287_v33  ;;  %2877 = vmatprep.subr.bf16.mxu1 %v3379_v6  ;;  %v3374_v6 = vld [vmem:[#allocation8 + $0x1f4] ss:$8 sps:$4 sm:$0xff]  }
 0x1ca   :  { %2288 = vmatpush1.bf16.msra.mxu0 %v3285_v34  ;;  %2878 = vmatpush3.bf16.msra.mxu1 %v3380_v7  ;;  %v3327_v34 = vld [vmem:[#allocation8 + $0x100] ss:$8 sps:$4 sm:$0xff]   ;;  %v3372_v7 = vld [vmem:[#allocation8 + $0x1f0] ss:$8 sps:$4 sm:$0xff]  }
 0x1cb   :  { %2289 = vmatprep.subr.bf16.mxu0 %v3290_v35  ;;  %2879 = vmatprep.subr.bf16.mxu1 %v3381_v8 }
 0x1ce   :  { %2290 = vmatpush1.bf16.msra.mxu0 %v3288_v36  ;;  %2880 = vmatpush3.bf16.msra.mxu1 %v3382_v9  ;;  %v3332_v36 = vld [vmem:[#allocation8 + $0x114] ss:$8 sps:$4 sm:$0xff]  }
 0x1cf   :  { %2291 = vmatprep.subr.bf16.mxu0 %v3293_v37  ;;  %2881 = vmatprep.subr.bf16.mxu1 %v3383_v10  ;;  %v3330_v37 = vld [vmem:[#allocation8 + $0x110] ss:$8 sps:$4 sm:$0xff]  }
 0x1d0   :  { %v3387_v10 = vld [vmem:[#allocation10 + $0x70] sm:$0xff]  }
 0x1d2   :  { %2292 = vmatpush1.bf16.msra.mxu0 %v3291_v38  ;;  %2882 = vmatpush3.bf16.msra.mxu1 %v3384_v11  ;;  %v3335_v38 = vld [vmem:[#allocation8 + $0x124] ss:$8 sps:$4 sm:$0xff]   ;;  %v3388_v11 = vld [vmem:[#allocation10 + $0x30] sm:$0xff]  }
 0x1d3   :  { %2293 = vmatprep.subr.bf16.mxu0 %v3296_v39  ;;  %2883 = vmatprep.subr.bf16.mxu1 %v3385_v13  ;;  %v3333_v39 = vld [vmem:[#allocation8 + $0x120] ss:$8 sps:$4 sm:$0xff]   ;;  %v1951_v13 = vld [vmem:[%s3757_s6] sm:$0x3]  ;;  %s3543_s6 = smov [#allocation11]  }
 0x1d4   :  { %v1960_v16 = vrot.slane %v1951_v13, %v3699_v0  ;;  %s2551_s10 = sshll.u32 %s3543_s6, 4  ;;  %s2552_s10 = int_to_ptr.vmem [resolvable:$true] %s2551_s10 }
 0x1d5   :  { %s3501_s13 = scalar_lea.vmem %s2552_s10, 32  ;;  %p3506_p13 = scmp.lt.s32.totalorder %s2552_s10, %s2552_s10 }
 0x1d6   :  { %2294 = vmatpush1.bf16.msra.mxu0 %v3294_v40  ;;  %2884 = vmatpush3.bf16.msra.mxu1 %v3386_v14  ;;  %v3338_v40 = vld [vmem:[#allocation8 + $0x134] ss:$8 sps:$4 sm:$0xff]   ;;  %v1956_v14 = vrot.slane %v1951_v13, %v3691_v62  ;;  %p3502_p12 = scmp.ne.s32.totalorder %s2552_s10, %s3501_s13  ;;  %p3507_p0 = scmp.lt.s32.totalorder %s3501_s13, %s3501_s13 }
 0x1d7   :  { %2295 = vmatprep.subr.bf16.mxu0 %v3299_v41  ;;  %v3336_v41 = vld [vmem:[#allocation8 + $0x130] ss:$8 sps:$4 sm:$0xff]   ;;  %2885 = vmatprep.subr.bf16.mxu1 %v3387_v10 }
 0x1d8   :  { %p3508_p1 = por %p3507_p0, %p3506_p13 }
 0x1da   :  { %2296 = vmatpush1.bf16.msra.mxu0 %v3297_v42  ;;  %v3341_v42 = vld [vmem:[#allocation8 + $0x144] ss:$8 sps:$4 sm:$0xff]   ;;  %2886 = vmatpush3.bf16.msra.mxu1 %v3388_v11  ;;  %p3509_p2 = pnand %p3508_p1, %p3502_p12 }
 0x1db   :  { %2297 = vmatprep.subr.bf16.mxu0 %v3302_v43  ;;  %v3339_v43 = vld [vmem:[#allocation8 + $0x140] ss:$8 sps:$4 sm:$0xff]   ;;  %2887 = vmatprep.subr.bf16.mxu1 %v3389_v27 }
 0x1de   :  { %2298 = vmatpush1.bf16.msra.mxu0 %v3300_v44  ;;  %v3344_v44 = vld [vmem:[#allocation8 + $0x154] ss:$8 sps:$4 sm:$0xff]   ;;  %2888 = vmatpush3.bf16.msra.mxu1 %v3390_v12 }
 0x1df   :  { %2299 = vmatprep.subr.bf16.mxu0 %v3305_v45  ;;  %v3342_v45 = vld [vmem:[#allocation8 + $0x150] ss:$8 sps:$4 sm:$0xff]  }
 0x1e2   :  { %2300 = vmatpush1.bf16.msra.mxu0 %v3303_v46  ;;  %v3347_v46 = vld [vmem:[#allocation8 + $0x164] ss:$8 sps:$4 sm:$0xff]  }
 0x1e3   :  { %2301 = vmatprep.subr.bf16.mxu0 %v3308_v47  ;;  %v3345_v47 = vld [vmem:[#allocation8 + $0x160] ss:$8 sps:$4 sm:$0xff]  }
 0x1e6   :  { %2302 = vmatpush1.bf16.msra.mxu0 %v3306_v48  ;;  %v3350_v48 = vld [vmem:[#allocation8 + $0x174] ss:$8 sps:$4 sm:$0xff]  }
 0x1e7   :  { %2303 = vmatprep.subr.bf16.mxu0 %v3311_v50  ;;  %v3348_v50 = vld [vmem:[#allocation8 + $0x170] ss:$8 sps:$4 sm:$0xff]  }
 0x1ea   :  { %2304 = vmatpush1.bf16.msra.mxu0 %v3309_v51  ;;  %v3353_v51 = vld [vmem:[#allocation8 + $0x184] ss:$8 sps:$4 sm:$0xff]  }
 0x1eb   :  { %2305 = vmatprep.subr.bf16.mxu0 %v3314_v53  ;;  %v3351_v53 = vld [vmem:[#allocation8 + $0x180] ss:$8 sps:$4 sm:$0xff]  }
 0x1ee   :  { %2306 = vmatpush1.bf16.msra.mxu0 %v3312_v54  ;;  %v3356_v54 = vld [vmem:[#allocation8 + $0x194] ss:$8 sps:$4 sm:$0xff]  }
 0x1ef   :  { %2307 = vmatprep.subr.bf16.mxu0 %v3317_v55  ;;  %v3354_v55 = vld [vmem:[#allocation8 + $0x190] ss:$8 sps:$4 sm:$0xff]  }
 0x1f2   :  { %2308 = vmatpush1.bf16.msra.mxu0 %v3315_v56  ;;  %v3359_v56 = vld [vmem:[#allocation8 + $0x1a4] ss:$8 sps:$4 sm:$0xff]  }
 0x1f3   :  { %2309 = vmatprep.subr.bf16.mxu0 %v3320_v57  ;;  %v3357_v57 = vld [vmem:[#allocation8 + $0x1a0] ss:$8 sps:$4 sm:$0xff]  }
 0x1f6   :  { %2310 = vmatpush1.bf16.msra.mxu0 %v3318_v58  ;;  %v3362_v58 = vld [vmem:[#allocation8 + $0x1b4] ss:$8 sps:$4 sm:$0xff]  }
 0x1f7   :  { %2311 = vmatprep.subr.bf16.mxu0 %v3323_v59  ;;  %v3360_v59 = vld [vmem:[#allocation8 + $0x1b0] ss:$8 sps:$4 sm:$0xff]  }
 0x1fa   :  { %2312 = vmatpush1.bf16.msra.mxu0 %v3321_v60  ;;  %v3365_v60 = vld [vmem:[#allocation8 + $0x1c4] ss:$8 sps:$4 sm:$0xff]  }
 0x1fb   :  { %2313 = vmatprep.subr.bf16.mxu0 %v3326_v61  ;;  %v3363_v61 = vld [vmem:[#allocation8 + $0x1c0] ss:$8 sps:$4 sm:$0xff]  }
 0x1fe   :  { %2314 = vmatpush1.bf16.msra.mxu0 %v3324_v49  ;;  %v3368_v49 = vld [vmem:[#allocation8 + $0x1d4] ss:$8 sps:$4 sm:$0xff]  }
 0x1ff   :  { %2324 = vmatprep.subr.bf16.mxu0 %v3329_v1  ;;  %v3366_v1 = vld [vmem:[#allocation8 + $0x1d0] ss:$8 sps:$4 sm:$0xff]  }
 0x294   :  { %v1790_v20 = vpop.f32.mrb[4].mxu0  ;;  %v3725_v21 = vpop.f32.mrb[8].mxu1 }
 0x295   :  { %v2901_v22 = vadd.f32 %v1790_v20, %v1058_v17  ;;  %v1792_v23 = vpop.f32.mrb[5].mxu0  ;;  %v1874_v24 = vpop.f32.mrb[9].mxu1  ;;  %v2903_v5 = vadd.f32 %v3725_v21, %v1066_v2 }
 0x296   :  { %v2902_v25 = vadd.f32 %v1792_v23, %v1062_v18  ;;  %v2904_v26 = vadd.f32 %v1874_v24, %v1070_v19  ;;  %v1794_v52 = vpop.f32.mrb[6].mxu0  ;;  %v1876_v28 = vpop.f32.mrb[10].mxu1 }
 0x297   :  { %v1879_v29 = vmax.f32 %v2901_v22, 0.0  ;;  %v1795_v30 = vpop.f32.mrb[7].mxu0  ;;  %v1877_v31 = vpop.f32.mrb[11].mxu1  ;;  %v1881_v8 = vmax.f32 %v2903_v5, 0.0  ;;  %v2856_v28 = vld [vmem:[%s3759_s8] ss:$0 sm:$0xff] }
 0x298   :  { %v1880_v32 = vmax.f32 %v2902_v25, 0.0  ;;  %v1882_v63 = vmax.f32 %v2904_v26, 0.0 }
 0x299   :  { %v1883_v35 = vpack.c.bf16 %v1879_v29, %v1879_v29  ;;  %v1885_v9 = vpack.c.bf16 %v1881_v8, %v1881_v8 }
 0x29a   :  { %v1884_v33 = vpack.c.bf16 %v1880_v32, %v1880_v32  ;;  %v1886_v15 = vpack.c.bf16 %v1882_v63, %v1882_v63 }
 0x29c   :  { %2315 = vmatprep.mubr.bf16.mxu0 %v1884_v33 }
 0x29d   :  { %2316 = vmatmul.mubr.bf16.vlgmr.msra.gmra.mrb[8].mxu0 %v1883_v35 }
 0x29e   :  { %2325 = vmatpush1.bf16.msra.mxu0 %v3327_v34  ;;  %2356 = vmatprep.mubr.bf16.mxu0 %v1886_v15 }
 0x29f   :  { %2326 = vmatprep.subr.bf16.mxu0 %v3332_v36 }
 0x2a2   :  { %2327 = vmatpush1.bf16.msra.mxu0 %v3330_v37 }
 0x2a3   :  { %2328 = vmatprep.subr.bf16.mxu0 %v3335_v38 }
 0x2a6   :  { %2329 = vmatpush1.bf16.msra.mxu0 %v3333_v39 }
 0x2a7   :  { %2330 = vmatprep.subr.bf16.mxu0 %v3338_v40 }
 0x2aa   :  { %2331 = vmatpush1.bf16.msra.mxu0 %v3336_v41 }
 0x2ab   :  { %2332 = vmatprep.subr.bf16.mxu0 %v3341_v42 }
 0x2ae   :  { %2333 = vmatpush1.bf16.msra.mxu0 %v3339_v43 }
 0x2af   :  { %2334 = vmatprep.subr.bf16.mxu0 %v3344_v44 }
 0x2b2   :  { %2335 = vmatpush1.bf16.msra.mxu0 %v3342_v45 }
 0x2b3   :  { %2336 = vmatprep.subr.bf16.mxu0 %v3347_v46 }
 0x2b6   :  { %2337 = vmatpush1.bf16.msra.mxu0 %v3345_v47 }
 0x2b7   :  { %2338 = vmatprep.subr.bf16.mxu0 %v3350_v48 }
 0x2ba   :  { %2339 = vmatpush1.bf16.msra.mxu0 %v3348_v50 }
 0x2bb   :  { %2340 = vmatprep.subr.bf16.mxu0 %v3353_v51 }
 0x2be   :  { %2341 = vmatpush1.bf16.msra.mxu0 %v3351_v53 }
 0x2bf   :  { %2342 = vmatprep.subr.bf16.mxu0 %v3356_v54 }
 0x2c2   :  { %2343 = vmatpush1.bf16.msra.mxu0 %v3354_v55 }
 0x2c3   :  { %2344 = vmatprep.subr.bf16.mxu0 %v3359_v56 }
 0x2c6   :  { %2345 = vmatpush1.bf16.msra.mxu0 %v3357_v57 }
 0x2c7   :  { %2346 = vmatprep.subr.bf16.mxu0 %v3362_v58 }
 0x2ca   :  { %2347 = vmatpush1.bf16.msra.mxu0 %v3360_v59 }
 0x2cb   :  { %2348 = vmatprep.subr.bf16.mxu0 %v3365_v60 }
 0x2ce   :  { %2349 = vmatpush1.bf16.msra.mxu0 %v3363_v61 }
 0x2cf   :  { %2350 = vmatprep.subr.bf16.mxu0 %v3368_v49 }
 0x2d2   :  { %2351 = vmatpush1.bf16.msra.mxu0 %v3366_v1 }
 0x2d3   :  { %2352 = vmatprep.subr.bf16.mxu0 %v3371_v3 }
 0x2d6   :  { %2353 = vmatpush1.bf16.msra.mxu0 %v3369_v4 }
 0x2d7   :  { %2354 = vmatprep.subr.bf16.mxu0 %v3374_v6 }
 0x2da   :  { %2355 = vmatpush1.bf16.msra.mxu0 %v3372_v7 }
 0x2dd   :  { %2357 = vmatmul.mubr.bf16.vlgmr.msra.gmra.mrb[8].mxu0 %v1885_v9 }
 0x3b0   :  { %v2358_v17 = vpop.f32.mrb[8].mxu0 }
 0x3b1   :  { %v2905_v18 = vadd.f32 %v2358_v17, %v1956_v14  ;;  %v2360_v19 = vpop.f32.mrb[9].mxu0 }
 0x3b2   :  { %v2906_v20 = vadd.f32 %v2360_v19, %v1960_v16  ;;  %v2362_v21 = vpop.f32.mrb[10].mxu0 }
 0x3b3   :  { %v2365_v22 = vmax.f32 %v2905_v18, 0.0  ;;  %v2363_v23 = vpop.f32.mrb[11].mxu0 }
 0x3b4   :  { %v2366_v24 = vmax.f32 %v2906_v20, 0.0 }
 0x3b5   :  { %v2367_v26 = vpack.c.bf16 %v2365_v22, %v2365_v22 }
 0x3b6   :  { %v2368_v25 = vpack.c.bf16 %v2366_v24, %v2366_v24 }
 0x3b8   :  { %2536 = vmatprep.mubr.bf16.mxu1 %v2368_v25 }
 0x3b9   :  { %2537 = vmatmul.mubr.bf16.vlgmr.msra.gmra.mrb[12].mxu1 %v2367_v26 }
 0x48c   :  { %v2889_v52 = vpop.f32.mrb[12].mxu1 }
 0x48d   :  { %v2890_v62 = vpop.f32.mrb[13].mxu1 }
 0x48e   :  { %v2891_v0 = vadd.f32 %v2890_v62, %v2889_v52  ;;  %v2892_v29 = vpop.f32.mrb[14].mxu1 }
 0x48f   :  { %v2893_v30 = vpop.f32.mrb[15].mxu1 }
 0x490   :  { %v2539_v31 = vadd.f32 %v2891_v0, %v2856_v28 }
 0x492   :  { %2544 = vst [vmem:[#allocation11] sm:$0x3] %v2539_v31 }
 0x493   :  { %3512 = shalt.err (!%p3509_p2)
}
 0x494   :  { %s3513_s8 = scalar_lea.hbm %s3760_s9, 32 }
 0x495   :  { %p3514_p3 = scmp.ne.s32.totalorder %s3760_s9, %s3513_s8  ;;  %p3517_p4 = scmp.lt.u32.totalorder %s3513_s8, %s3760_s9 }
 0x497   :  { %p3519_p5 = pnand %p3517_p4, %p3514_p3 }
 0x499   :  { %3522 = shalt.err (!%p3519_p5)
}
 0x49a   :  { %2554 = dma.vmem_to_hbm [thread:$0]  %s2552_s10, 32, %s3760_s9, [#allocation4]  }
 0x49b   :  { %3529 = dma.done.wait [#allocation4], 32  }
 0x49c   :  { %3530 = vsyncadd [#allocation4], 4294967264 }
 0x49d   :  { %2558 = vsyncpa [#allocation3], 1 }
 0x49e   :  { %2559 = vsyncpa [#allocation6], 1 }
 0x49f   :  { %2560 = vsyncpa [#allocation9], 1 }
 0x4a0   :  { %2561 = vsyncpa [#allocation4], 1 }

</bundles_post_ra>
